<compile_context>
chip_gen: v7x
topology: tpu7x:2x2x1
jax: 0.10.0
libtpu: 0.0.40
codegen_flags: <defaults>
</compile_context>

<pallas_src>
import functools

import jax
import jax.numpy as jnp
from jax.experimental import pallas as pl
from jax.experimental.pallas import tpu as pltpu


def _attnpool_kernel(scale,
                     x_ref, pos0_ref, posr_ref, hmask_ref, hmask_t_ref,
                     wq_ref, bq_ref, wk_ref, bk_ref, wv_ref, bv_ref,
                     wc_ref, bc_ref, o_ref, t0_bf, tr_bf):
    g = pl.program_id(1)

    @pl.when(g == 0)
    def _init():
        xt = x_ref[0]                                               # (HW, C) f32
        t0 = jnp.mean(xt, axis=0, keepdims=True) + pos0_ref[...]    # mean token
        tr = xt + posr_ref[...]                                     # spatial tokens
        t0_bf[...] = t0.astype(jnp.bfloat16)
        tr_bf[...] = tr.astype(jnp.bfloat16)
        o_ref[0] = bc_ref[...]            # init resident accumulator with c_proj bias

    t0b = t0_bf[...]                                                # (1, C)  bf16
    trb = tr_bf[...]                                                # (HW, C) bf16

    # q/k/v projections for this channel group: bf16 MXU, f32 accumulate, f32 bias.
    q = (jnp.dot(t0b, wq_ref[...], preferred_element_type=jnp.float32)
         + bq_ref[...]) * scale                                     # (1, Cg)
    k0 = jnp.dot(t0b, wk_ref[...], preferred_element_type=jnp.float32) + bk_ref[...]
    kr = jnp.dot(trb, wk_ref[...], preferred_element_type=jnp.float32) + bk_ref[...]
    v0 = jnp.dot(t0b, wv_ref[...], preferred_element_type=jnp.float32) + bv_ref[...]
    vr = jnp.dot(trb, wv_ref[...], preferred_element_type=jnp.float32) + bv_ref[...]

    # Per-head scores via block-diagonal head mask (no reshapes / head loops):
    #   s[l, h] = sum_{c in head h} k[l, c] * q[c]
    hmask = hmask_ref[...]                                          # (Cg, Hg) f32
    s0 = jnp.dot(k0 * q, hmask, preferred_element_type=jnp.float32)  # (1, Hg)
    sr = jnp.dot(kr * q, hmask, preferred_element_type=jnp.float32)  # (HW, Hg)

    # Softmax over the HW+1 tokens, per head, in f32.
    m = jnp.maximum(s0, jnp.max(sr, axis=0, keepdims=True))          # (1, Hg)
    p0 = jnp.exp(s0 - m)
    pr = jnp.exp(sr - m)
    inv = 1.0 / (p0 + jnp.sum(pr, axis=0, keepdims=True))            # (1, Hg)

    # Spread per-head weights back onto channels and pool the values.
    hmask_t = hmask_t_ref[...]                                       # (Hg, Cg)
    w0c = jnp.dot(p0 * inv, hmask_t, preferred_element_type=jnp.float32)  # (1, Cg)
    wrc = jnp.dot(pr * inv, hmask_t, preferred_element_type=jnp.float32)  # (HW, Cg)
    pooled = w0c * v0 + jnp.sum(wrc * vr, axis=0, keepdims=True)          # (1, Cg)

    # Partial output projection (this group's rows of c_proj), accumulated into
    # the resident output block.
    contrib = jnp.dot(pooled.astype(jnp.bfloat16), wc_ref[...],
                      preferred_element_type=jnp.float32)                 # (1, Cout)
    o_ref[0] = o_ref[0] + contrib


def attention_pool2d(x_nchw, params, num_heads):
    N, C, H, W = x_nchw.shape
    HW = H * W
    Cout = params["wc"].shape[1]
    assert C % num_heads == 0
    hd = C // num_heads
    scale = float(hd) ** -0.5

    # Channel-group tile of the embed dim: 128 lanes if possible, head aligned.
    Cg = 128 if (C > 128 and C % 128 == 0 and 128 % hd == 0) else C
    G = C // Cg
    hpg = Cg // hd                                       # heads per group

    # NCHW -> (N, HW, C) spatial tokens (layout glue only; the rest is fused).
    x_tok = jnp.transpose(x_nchw, (0, 2, 3, 1)).reshape(N, HW, C)

    # Block-diagonal head mask for one channel group (identical for all groups).
    hmask = (jnp.arange(Cg)[:, None] // hd
             == jnp.arange(hpg)[None, :]).astype(jnp.float32)        # (Cg, hpg)
    hmask_t = hmask.T                                                # (hpg, Cg)

    kernel = functools.partial(_attnpool_kernel, scale)

    def const(b, g):
        return (0, 0)

    def col_tile(b, g):
        return (0, g)

    L = HW + 1
    flops = N * (2 * C * C * (2 * L + 1) + 2 * C * Cout + 4 * L * C * num_heads)
    bytes_accessed = (x_tok.size * 4 + N * Cout * 4
                      + sum(int(v.size) * v.dtype.itemsize for v in params.values()))
    cost = pl.CostEstimate(flops=int(flops),
                           transcendentals=int(N * L * num_heads),
                           bytes_accessed=int(bytes_accessed))

    out = pl.pallas_call(
        kernel,
        out_shape=jax.ShapeDtypeStruct((N, 1, Cout), jnp.float32),
        grid=(N, G),
        in_specs=[
            pl.BlockSpec((1, HW, C), lambda b, g: (b, 0, 0)),   # spatial tokens
            pl.BlockSpec((1, C), const),                        # pos[0:1]
            pl.BlockSpec((HW, C), const),                       # pos[1:]
            pl.BlockSpec((Cg, hpg), const),                     # head mask
            pl.BlockSpec((hpg, Cg), const),                     # head mask^T
            pl.BlockSpec((C, Cg), col_tile),                    # Wq column tile
            pl.BlockSpec((1, Cg), col_tile),                    # bq tile
            pl.BlockSpec((C, Cg), col_tile),                    # Wk column tile
            pl.BlockSpec((1, Cg), col_tile),                    # bk tile
            pl.BlockSpec((C, Cg), col_tile),                    # Wv column tile
            pl.BlockSpec((1, Cg), col_tile),                    # bv tile
            pl.BlockSpec((Cg, Cout), lambda b, g: (g, 0)),      # Wc row tile
            pl.BlockSpec((1, Cout), const),                     # bc
        ],
        out_specs=pl.BlockSpec((1, 1, Cout), lambda b, g: (b, 0, 0)),
        scratch_shapes=[
            pltpu.VMEM((1, C), jnp.bfloat16),                   # bf16 mean token
            pltpu.VMEM((HW, C), jnp.bfloat16),                  # bf16 spatial tokens
        ],
        compiler_params=pltpu.CompilerParams(
            dimension_semantics=("parallel", "arbitrary"),
            vmem_limit_bytes=64 * 1024 * 1024,
        ),
        cost_estimate=cost,
    )(x_tok, params["pos0"], params["posR"], hmask, hmask_t,
      params["wq"], params["bq"], params["wk"], params["bk"],
      params["wv"], params["bv"], params["wc"], params["bc"])
    return out.reshape(N, Cout)


# ---------------------------------------------------------------------------
# Pure-JAX reference (F.multi_head_attention_forward semantics).
# mixed=True mirrors the kernel's precision (bf16 MXU inputs, f32 accumulate).
# ---------------------------------------------------------------------------
def ref_forward(x_nchw, raw, num_heads, mixed=False):
    if mixed:
        cast = lambda a: a.astype(jnp.bfloat16).astype(jnp.float32)
    else:
        cast = lambda a: a
    N, C, H, W = x_nchw.shape
    HW = H * W
    L = HW + 1
    with jax.default_matmul_precision("highest"):
        t = x_nchw.reshape(N, C, HW).transpose(2, 0, 1)               # (HW, N, C)
        t = jnp.concatenate([jnp.mean(t, axis=0, keepdims=True), t], axis=0)
        t = t + raw["pos"][:, None, :]                                # (L, N, C)
        q = cast(t[:1]) @ cast(raw["wq"]).T + raw["bq"]
        k = cast(t) @ cast(raw["wk"]).T + raw["bk"]
        v = cast(t) @ cast(raw["wv"]).T + raw["bv"]
        hd = C // num_heads
        q = q * float(hd) ** -0.5
        qh = q.reshape(1, N * num_heads, hd).transpose(1, 0, 2)       # (N*h, 1, hd)
        kh = k.reshape(L, N * num_heads, hd).transpose(1, 0, 2)       # (N*h, L, hd)
        vh = v.reshape(L, N * num_heads, hd).transpose(1, 0, 2)
        attn = jax.nn.softmax(jnp.einsum("bqd,bkd->bqk", qh, kh), axis=-1)
        o = jnp.einsum("bqk,bkd->bqd", attn, vh)                      # (N*h, 1, hd)
        o = o.transpose(1, 0, 2).reshape(N, C)
        return cast(o) @ cast(raw["wc"]).T + raw["bc"]                # (N, Cout)


# ---------------------------------------------------------------------------
# Deterministic parameter construction (PyTorch layouts in `raw`,
# kernel-packed / bf16 weights in `params`).
# ---------------------------------------------------------------------------
def make_params(key, embed_dim, num_heads, output_dim, hw):
    L = hw + 1
    ks = jax.random.split(key, 10)

    def w(k, shape, s):
        return (s * jax.random.normal(k, shape)).astype(jnp.float32)

    raw = {
        "pos": (jax.random.normal(ks[0], (L, embed_dim))
                / embed_dim ** 0.5).astype(jnp.float32),
        "wq": w(ks[1], (embed_dim, embed_dim), 0.05),
        "bq": w(ks[2], (embed_dim,), 0.05),
        "wk": w(ks[3], (embed_dim, embed_dim), 0.05),
        "bk": w(ks[4], (embed_dim,), 0.05),
        "wv": w(ks[5], (embed_dim, embed_dim), 0.1),
        "bv": w(ks[6], (embed_dim,), 0.05),
        "wc": w(ks[7], (output_dim, embed_dim), 0.1),
        "bc": w(ks[8], (output_dim,), 0.05),
    }
    params = {
        "pos0": raw["pos"][:1],                                  # (1, C)
        "posR": raw["pos"][1:],                                  # (HW, C)
        "wq": raw["wq"].T.astype(jnp.bfloat16),                  # (C, C)
        "bq": raw["bq"].reshape(1, embed_dim),
        "wk": raw["wk"].T.astype(jnp.bfloat16),
        "bk": raw["bk"].reshape(1, embed_dim),
        "wv": raw["wv"].T.astype(jnp.bfloat16),
        "bv": raw["bv"].reshape(1, embed_dim),
        "wc": raw["wc"].T.astype(jnp.bfloat16),                  # (C, Cout)
        "bc": raw["bc"].reshape(1, output_dim),
    }
    return params, raw


# ---------------------------------------------------------------------------
if __name__ == "__main__":
    key = jax.random.PRNGKey(0)
    kx, kp = jax.random.split(key)

    # Small CLIP-style config: 8x8 feature map, 256-d embed, 8 heads, 128-d output
    # (embed_dim chosen so the channel-group grid axis (Cg=128, G=2) is exercised).
    N, embed_dim, num_heads, output_dim, spacial_dim = 2, 256, 8, 128, 8
    H = W = spacial_dim

    x = jax.random.normal(kx, (N, embed_dim, H, W), dtype=jnp.float32)
    params, raw = make_params(kp, embed_dim, num_heads, output_dim, H * W)

    out = attention_pool2d(x, params, num_heads)
    out = jax.block_until_ready(out)
    assert out.shape == (N, output_dim), out.shape

    # Tight check vs a reference that mirrors the kernel's bf16-MXU / f32-accumulate
    # precision, plus a sanity check vs the pure-f32 reference (bf16-level deviation
    # only is expected there).
    ref_mixed = ref_forward(x, raw, num_heads, mixed=True)
    ref_f32 = ref_forward(x, raw, num_heads, mixed=False)
    err = float(jnp.max(jnp.abs(out - ref_mixed)))
    rel = float(jnp.linalg.norm(out - ref_f32) / jnp.linalg.norm(ref_f32))
    assert err < 5e-3, f"max abs err vs mixed-precision reference: {err}"
    assert rel < 1e-1, f"relative err vs f32 reference: {rel}"
    print("KERNEL_OK")
</pallas_src>

<mosaic_0001>
module attributes {stable_mosaic.version = 11 : i64} {
  func.func @_attnpool_kernel(%arg0: i32, %arg1: i32, %arg2: memref<1x64x256xf32, #tpu.memory_space<vmem>>, %arg3: memref<1x256xf32, #tpu.memory_space<vmem>>, %arg4: memref<64x256xf32, #tpu.memory_space<vmem>>, %arg5: memref<128x4xf32, #tpu.memory_space<vmem>>, %arg6: memref<4x128xf32, #tpu.memory_space<vmem>>, %arg7: memref<256x128xbf16, #tpu.memory_space<vmem>>, %arg8: memref<1x128xf32, #tpu.memory_space<vmem>>, %arg9: memref<256x128xbf16, #tpu.memory_space<vmem>>, %arg10: memref<1x128xf32, #tpu.memory_space<vmem>>, %arg11: memref<256x128xbf16, #tpu.memory_space<vmem>>, %arg12: memref<1x128xf32, #tpu.memory_space<vmem>>, %arg13: memref<128x128xbf16, #tpu.memory_space<vmem>>, %arg14: memref<1x128xf32, #tpu.memory_space<vmem>>, %arg15: memref<1x1x128xf32, #tpu.memory_space<vmem>>, %arg16: memref<1x256xbf16, #tpu.memory_space<vmem>>, %arg17: memref<64x256xbf16, #tpu.memory_space<vmem>>) attributes {dimension_semantics = [#tpu.dimension_semantics<parallel>, #tpu.dimension_semantics<arbitrary>], iteration_bounds = array<i64: 2, 2>, scalar_prefetch = 0 : i64, scratch_operands = 2 : i64, tpu.core_type = #tpu.core_type<tc>, window_params = [{transform_indices = @transform_0, window_bounds = array<i64: 1, 64, 256>}, {pipeline_mode = #tpu.pipeline_mode<synchronous>, transform_indices = @transform_1, window_bounds = array<i64: 1, 256>}, {pipeline_mode = #tpu.pipeline_mode<synchronous>, transform_indices = @transform_2, window_bounds = array<i64: 64, 256>}, {pipeline_mode = #tpu.pipeline_mode<synchronous>, transform_indices = @transform_3, window_bounds = array<i64: 128, 4>}, {pipeline_mode = #tpu.pipeline_mode<synchronous>, transform_indices = @transform_4, window_bounds = array<i64: 4, 128>}, {transform_indices = @transform_5, window_bounds = array<i64: 256, 128>}, {transform_indices = @transform_6, window_bounds = array<i64: 1, 128>}, {transform_indices = @transform_7, window_bounds = array<i64: 256, 128>}, {transform_indices = @transform_8, window_bounds = array<i64: 1, 128>}, {transform_indices = @transform_9, window_bounds = array<i64: 256, 128>}, {transform_indices = @transform_10, window_bounds = array<i64: 1, 128>}, {transform_indices = @transform_11, window_bounds = array<i64: 128, 128>}, {pipeline_mode = #tpu.pipeline_mode<synchronous>, transform_indices = @transform_12, window_bounds = array<i64: 1, 128>}, {transform_indices = @transform_13, window_bounds = array<i64: 1, 1, 128>}]} {
    %c0_i32 = arith.constant 0 : i32
    %0 = arith.cmpi eq, %arg1, %c0_i32 : i32
    %1 = arith.extui %0 : i1 to i32
    %c0_i32_0 = arith.constant 0 : i32
    %2 = arith.cmpi ne, %1, %c0_i32_0 : i32
    scf.if %2 {
      %c0_50 = arith.constant 0 : index
      %c0_51 = arith.constant 0 : index
      %c0_52 = arith.constant 0 : index
      %68 = vector.load %arg2[%c0_50, %c0_51, %c0_52] : memref<1x64x256xf32, #tpu.memory_space<vmem>>, vector<1x64x256xf32>
      %69 = vector.shape_cast %68 : vector<1x64x256xf32> to vector<64x256xf32>
      %cst_53 = arith.constant dense<0.000000e+00> : vector<256xf32>
      %70 = vector.multi_reduction <add>, %69, %cst_53 [0] : vector<64x256xf32> to vector<256xf32>
      %71 = vector.shape_cast %70 : vector<256xf32> to vector<1x256xf32>
      %cst_54 = arith.constant 6.400000e+01 : f32
      %72 = vector.broadcast %cst_54 : f32 to vector<1x256xf32>
      %73 = arith.divf %71, %72 : vector<1x256xf32>
      %c0_55 = arith.constant 0 : index
      %c0_56 = arith.constant 0 : index
      %74 = vector.load %arg3[%c0_55, %c0_56] : memref<1x256xf32, #tpu.memory_space<vmem>>, vector<1x256xf32>
      %75 = arith.addf %73, %74 : vector<1x256xf32>
      %c0_57 = arith.constant 0 : index
      %c0_58 = arith.constant 0 : index
      %76 = vector.load %arg4[%c0_57, %c0_58] : memref<64x256xf32, #tpu.memory_space<vmem>>, vector<64x256xf32>
      %77 = arith.addf %69, %76 : vector<64x256xf32>
      %78 = arith.truncf %75 : vector<1x256xf32> to vector<1x256xbf16>
      %c0_59 = arith.constant 0 : index
      %c0_60 = arith.constant 0 : index
      %79 = vector.load %arg16[%c0_59, %c0_60] : memref<1x256xbf16, #tpu.memory_space<vmem>>, vector<1x256xbf16>
      tpu.vector_store %arg16[%c0_59, %c0_60], %78 {strides = array<i32>} : memref<1x256xbf16, #tpu.memory_space<vmem>>, vector<1x256xbf16>,
      %80 = arith.truncf %77 : vector<64x256xf32> to vector<64x256xbf16>
      %c0_61 = arith.constant 0 : index
      %c0_62 = arith.constant 0 : index
      %81 = vector.load %arg17[%c0_61, %c0_62] : memref<64x256xbf16, #tpu.memory_space<vmem>>, vector<64x256xbf16>
      tpu.vector_store %arg17[%c0_61, %c0_62], %80 {strides = array<i32>} : memref<64x256xbf16, #tpu.memory_space<vmem>>, vector<64x256xbf16>,
      %c0_63 = arith.constant 0 : index
      %c0_64 = arith.constant 0 : index
      %82 = vector.load %arg14[%c0_63, %c0_64] : memref<1x128xf32, #tpu.memory_space<vmem>>, vector<1x128xf32>
      %c0_65 = arith.constant 0 : index
      %c0_66 = arith.constant 0 : index
      %c0_67 = arith.constant 0 : index
      %83 = vector.load %arg15[%c0_65, %c0_66, %c0_67] : memref<1x1x128xf32, #tpu.memory_space<vmem>>, vector<1x1x128xf32>
      %84 = vector.shape_cast %83 : vector<1x1x128xf32> to vector<1x128xf32>
      %85 = vector.shape_cast %82 : vector<1x128xf32> to vector<1x1x128xf32>
      tpu.vector_store %arg15[%c0_65, %c0_66, %c0_67], %85 {strides = array<i32>} : memref<1x1x128xf32, #tpu.memory_space<vmem>>, vector<1x1x128xf32>,
    } else {
    }
    %c0 = arith.constant 0 : index
    %c0_1 = arith.constant 0 : index
    %3 = vector.load %arg16[%c0, %c0_1] : memref<1x256xbf16, #tpu.memory_space<vmem>>, vector<1x256xbf16>
    %c0_2 = arith.constant 0 : index
    %c0_3 = arith.constant 0 : index
    %4 = vector.load %arg17[%c0_2, %c0_3] : memref<64x256xbf16, #tpu.memory_space<vmem>>, vector<64x256xbf16>
    %c0_4 = arith.constant 0 : index
    %c0_5 = arith.constant 0 : index
    %5 = vector.load %arg7[%c0_4, %c0_5] : memref<256x128xbf16, #tpu.memory_space<vmem>>, vector<256x128xbf16>
    %cst = arith.constant dense<0.000000e+00> : vector<1x128xf32>
    %6 = tpu.matmul %3, %5, %cst {dimension_numbers = #tpu.dot_dimension_numbers<[1], [0], [0], [1], [0, 0, 1, 1], [], []>} : vector<1x256xbf16>, vector<256x128xbf16>, vector<1x128xf32> -> vector<1x128xf32>
    %c0_6 = arith.constant 0 : index
    %c0_7 = arith.constant 0 : index
    %7 = vector.load %arg8[%c0_6, %c0_7] : memref<1x128xf32, #tpu.memory_space<vmem>>, vector<1x128xf32>
    %8 = arith.addf %6, %7 : vector<1x128xf32>
    %cst_8 = arith.constant 0.176776692 : f32
    %9 = vector.broadcast %cst_8 : f32 to vector<1x128xf32>
    %10 = arith.mulf %8, %9 : vector<1x128xf32>
    %c0_9 = arith.constant 0 : index
    %c0_10 = arith.constant 0 : index
    %11 = vector.load %arg9[%c0_9, %c0_10] : memref<256x128xbf16, #tpu.memory_space<vmem>>, vector<256x128xbf16>
    %cst_11 = arith.constant dense<0.000000e+00> : vector<1x128xf32>
    %12 = tpu.matmul %3, %11, %cst_11 {dimension_numbers = #tpu.dot_dimension_numbers<[1], [0], [0], [1], [0, 0, 1, 1], [], []>} : vector<1x256xbf16>, vector<256x128xbf16>, vector<1x128xf32> -> vector<1x128xf32>
    %c0_12 = arith.constant 0 : index
    %c0_13 = arith.constant 0 : index
    %13 = vector.load %arg10[%c0_12, %c0_13] : memref<1x128xf32, #tpu.memory_space<vmem>>, vector<1x128xf32>
    %14 = arith.addf %12, %13 : vector<1x128xf32>
    %c0_14 = arith.constant 0 : index
    %c0_15 = arith.constant 0 : index
    %15 = vector.load %arg9[%c0_14, %c0_15] : memref<256x128xbf16, #tpu.memory_space<vmem>>, vector<256x128xbf16>
    %cst_16 = arith.constant dense<0.000000e+00> : vector<64x128xf32>
    %16 = tpu.matmul %4, %15, %cst_16 {dimension_numbers = #tpu.dot_dimension_numbers<[1], [0], [0], [1], [0, 0, 1, 1], [], []>} : vector<64x256xbf16>, vector<256x128xbf16>, vector<64x128xf32> -> vector<64x128xf32>
    %c0_17 = arith.constant 0 : index
    %c0_18 = arith.constant 0 : index
    %17 = vector.load %arg10[%c0_17, %c0_18] : memref<1x128xf32, #tpu.memory_space<vmem>>, vector<1x128xf32>
    %18 = vector.broadcast %17 : vector<1x128xf32> to vector<64x128xf32>
    %19 = arith.addf %16, %18 : vector<64x128xf32>
    %c0_19 = arith.constant 0 : index
    %c0_20 = arith.constant 0 : index
    %20 = vector.load %arg11[%c0_19, %c0_20] : memref<256x128xbf16, #tpu.memory_space<vmem>>, vector<256x128xbf16>
    %cst_21 = arith.constant dense<0.000000e+00> : vector<1x128xf32>
    %21 = tpu.matmul %3, %20, %cst_21 {dimension_numbers = #tpu.dot_dimension_numbers<[1], [0], [0], [1], [0, 0, 1, 1], [], []>} : vector<1x256xbf16>, vector<256x128xbf16>, vector<1x128xf32> -> vector<1x128xf32>
    %c0_22 = arith.constant 0 : index
    %c0_23 = arith.constant 0 : index
    %22 = vector.load %arg12[%c0_22, %c0_23] : memref<1x128xf32, #tpu.memory_space<vmem>>, vector<1x128xf32>
    %23 = arith.addf %21, %22 : vector<1x128xf32>
    %c0_24 = arith.constant 0 : index
    %c0_25 = arith.constant 0 : index
    %24 = vector.load %arg11[%c0_24, %c0_25] : memref<256x128xbf16, #tpu.memory_space<vmem>>, vector<256x128xbf16>
    %cst_26 = arith.constant dense<0.000000e+00> : vector<64x128xf32>
    %25 = tpu.matmul %4, %24, %cst_26 {dimension_numbers = #tpu.dot_dimension_numbers<[1], [0], [0], [1], [0, 0, 1, 1], [], []>} : vector<64x256xbf16>, vector<256x128xbf16>, vector<64x128xf32> -> vector<64x128xf32>
    %c0_27 = arith.constant 0 : index
    %c0_28 = arith.constant 0 : index
    %26 = vector.load %arg12[%c0_27, %c0_28] : memref<1x128xf32, #tpu.memory_space<vmem>>, vector<1x128xf32>
    %27 = vector.broadcast %26 : vector<1x128xf32> to vector<64x128xf32>
    %28 = arith.addf %25, %27 : vector<64x128xf32>
    %c0_29 = arith.constant 0 : index
    %c0_30 = arith.constant 0 : index
    %29 = vector.load %arg5[%c0_29, %c0_30] : memref<128x4xf32, #tpu.memory_space<vmem>>, vector<128x4xf32>
    %30 = arith.mulf %14, %10 : vector<1x128xf32>
    %cst_31 = arith.constant dense<0.000000e+00> : vector<1x4xf32>
    %31 = tpu.matmul %30, %29, %cst_31 {dimension_numbers = #tpu.dot_dimension_numbers<[1], [0], [0], [1], [0, 0, 1, 1], [], []>} : vector<1x128xf32>, vector<128x4xf32>, vector<1x4xf32> -> vector<1x4xf32>
    %32 = vector.broadcast %10 : vector<1x128xf32> to vector<64x128xf32>
    %33 = arith.mulf %19, %32 : vector<64x128xf32>
    %cst_32 = arith.constant dense<0.000000e+00> : vector<64x4xf32>
    %34 = tpu.matmul %33, %29, %cst_32 {dimension_numbers = #tpu.dot_dimension_numbers<[1], [0], [0], [1], [0, 0, 1, 1], [], []>} : vector<64x128xf32>, vector<128x4xf32>, vector<64x4xf32> -> vector<64x4xf32>
    %cst_33 = arith.constant dense<0xFF800000> : vector<4xf32>
    %35 = vector.multi_reduction <maximumf>, %34, %cst_33 [0] : vector<64x4xf32> to vector<4xf32>
    %36 = vector.shape_cast %35 : vector<4xf32> to vector<1x4xf32>
    %37 = arith.maximumf %31, %36 : vector<1x4xf32>
    %38 = arith.subf %31, %37 : vector<1x4xf32>
    %39 = math.exp %38 : vector<1x4xf32>
    %40 = vector.broadcast %37 : vector<1x4xf32> to vector<64x4xf32>
    %41 = arith.subf %34, %40 : vector<64x4xf32>
    %42 = math.exp %41 : vector<64x4xf32>
    %cst_34 = arith.constant dense<0.000000e+00> : vector<4xf32>
    %43 = vector.multi_reduction <add>, %42, %cst_34 [0] : vector<64x4xf32> to vector<4xf32>
    %44 = vector.shape_cast %43 : vector<4xf32> to vector<1x4xf32>
    %45 = arith.addf %39, %44 : vector<1x4xf32>
    %cst_35 = arith.constant 1.000000e+00 : f32
    %46 = vector.broadcast %cst_35 : f32 to vector<1x4xf32>
    %47 = arith.divf %46, %45 : vector<1x4xf32>
    %c0_36 = arith.constant 0 : index
    %c0_37 = arith.constant 0 : index
    %48 = vector.load %arg6[%c0_36, %c0_37] : memref<4x128xf32, #tpu.memory_space<vmem>>, vector<4x128xf32>
    %49 = arith.mulf %39, %47 : vector<1x4xf32>
    %cst_38 = arith.constant dense<0.000000e+00> : vector<1x128xf32>
    %50 = tpu.matmul %49, %48, %cst_38 {dimension_numbers = #tpu.dot_dimension_numbers<[1], [0], [0], [1], [0, 0, 1, 1], [], []>} : vector<1x4xf32>, vector<4x128xf32>, vector<1x128xf32> -> vector<1x128xf32>
    %51 = vector.broadcast %47 : vector<1x4xf32> to vector<64x4xf32>
    %52 = arith.mulf %42, %51 : vector<64x4xf32>
    %cst_39 = arith.constant dense<0.000000e+00> : vector<64x128xf32>
    %53 = tpu.matmul %52, %48, %cst_39 {dimension_numbers = #tpu.dot_dimension_numbers<[1], [0], [0], [1], [0, 0, 1, 1], [], []>} : vector<64x4xf32>, vector<4x128xf32>, vector<64x128xf32> -> vector<64x128xf32>
    %54 = arith.mulf %50, %23 : vector<1x128xf32>
    %55 = arith.mulf %53, %28 : vector<64x128xf32>
    %cst_40 = arith.constant dense<0.000000e+00> : vector<128xf32>
    %56 = vector.multi_reduction <add>, %55, %cst_40 [0] : vector<64x128xf32> to vector<128xf32>
    %57 = vector.shape_cast %56 : vector<128xf32> to vector<1x128xf32>
    %58 = arith.addf %54, %57 : vector<1x128xf32>
    %59 = arith.truncf %58 : vector<1x128xf32> to vector<1x128xbf16>
    %c0_41 = arith.constant 0 : index
    %c0_42 = arith.constant 0 : index
    %60 = vector.load %arg13[%c0_41, %c0_42] : memref<128x128xbf16, #tpu.memory_space<vmem>>, vector<128x128xbf16>
    %cst_43 = arith.constant dense<0.000000e+00> : vector<1x128xf32>
    %61 = tpu.matmul %59, %60, %cst_43 {dimension_numbers = #tpu.dot_dimension_numbers<[1], [0], [0], [1], [0, 0, 1, 1], [], []>} : vector<1x128xbf16>, vector<128x128xbf16>, vector<1x128xf32> -> vector<1x128xf32>
    %c0_44 = arith.constant 0 : index
    %c0_45 = arith.constant 0 : index
    %c0_46 = arith.constant 0 : index
    %62 = vector.load %arg15[%c0_44, %c0_45, %c0_46] : memref<1x1x128xf32, #tpu.memory_space<vmem>>, vector<1x1x128xf32>
    %63 = vector.shape_cast %62 : vector<1x1x128xf32> to vector<1x128xf32>
    %64 = arith.addf %63, %61 : vector<1x128xf32>
    %c0_47 = arith.constant 0 : index
    %c0_48 = arith.constant 0 : index
    %c0_49 = arith.constant 0 : index
    %65 = vector.load %arg15[%c0_47, %c0_48, %c0_49] : memref<1x1x128xf32, #tpu.memory_space<vmem>>, vector<1x1x128xf32>
    %66 = vector.shape_cast %65 : vector<1x1x128xf32> to vector<1x128xf32>
    %67 = vector.shape_cast %64 : vector<1x128xf32> to vector<1x1x128xf32>
    tpu.vector_store %arg15[%c0_47, %c0_48, %c0_49], %67 {strides = array<i32>} : memref<1x1x128xf32, #tpu.memory_space<vmem>>, vector<1x1x128xf32>,
    return
  }
  func.func @transform_0(%arg0: i32, %arg1: i32) -> (i32, i32, i32) {
    %c0_i32 = arith.constant 0 : i32
    %c0_i32_0 = arith.constant 0 : i32
    %c0_i32_1 = arith.constant 0 : i32
    return %arg0, %c0_i32, %c0_i32_0 : i32, i32, i32
  }
  func.func @transform_1(%arg0: i32, %arg1: i32) -> (i32, i32) {
    %c0_i32 = arith.constant 0 : i32
    %c0_i32_0 = arith.constant 0 : i32
    %c0_i32_1 = arith.constant 0 : i32
    return %c0_i32, %c0_i32_0 : i32, i32
  }
  func.func @transform_2(%arg0: i32, %arg1: i32) -> (i32, i32) {
    %c0_i32 = arith.constant 0 : i32
    %c0_i32_0 = arith.constant 0 : i32
    %c0_i32_1 = arith.constant 0 : i32
    return %c0_i32, %c0_i32_0 : i32, i32
  }
  func.func @transform_3(%arg0: i32, %arg1: i32) -> (i32, i32) {
    %c0_i32 = arith.constant 0 : i32
    %c0_i32_0 = arith.constant 0 : i32
    %c0_i32_1 = arith.constant 0 : i32
    return %c0_i32, %c0_i32_0 : i32, i32
  }
  func.func @transform_4(%arg0: i32, %arg1: i32) -> (i32, i32) {
    %c0_i32 = arith.constant 0 : i32
    %c0_i32_0 = arith.constant 0 : i32
    %c0_i32_1 = arith.constant 0 : i32
    return %c0_i32, %c0_i32_0 : i32, i32
  }
  func.func @transform_5(%arg0: i32, %arg1: i32) -> (i32, i32) {
    %c0_i32 = arith.constant 0 : i32
    %c0_i32_0 = arith.constant 0 : i32
    return %c0_i32, %arg1 : i32, i32
  }
  func.func @transform_6(%arg0: i32, %arg1: i32) -> (i32, i32) {
    %c0_i32 = arith.constant 0 : i32
    %c0_i32_0 = arith.constant 0 : i32
    return %c0_i32, %arg1 : i32, i32
  }
  func.func @transform_7(%arg0: i32, %arg1: i32) -> (i32, i32) {
    %c0_i32 = arith.constant 0 : i32
    %c0_i32_0 = arith.constant 0 : i32
    return %c0_i32, %arg1 : i32, i32
  }
  func.func @transform_8(%arg0: i32, %arg1: i32) -> (i32, i32) {
    %c0_i32 = arith.constant 0 : i32
    %c0_i32_0 = arith.constant 0 : i32
    return %c0_i32, %arg1 : i32, i32
  }
  func.func @transform_9(%arg0: i32, %arg1: i32) -> (i32, i32) {
    %c0_i32 = arith.constant 0 : i32
    %c0_i32_0 = arith.constant 0 : i32
    return %c0_i32, %arg1 : i32, i32
  }
  func.func @transform_10(%arg0: i32, %arg1: i32) -> (i32, i32) {
    %c0_i32 = arith.constant 0 : i32
    %c0_i32_0 = arith.constant 0 : i32
    return %c0_i32, %arg1 : i32, i32
  }
  func.func @transform_11(%arg0: i32, %arg1: i32) -> (i32, i32) {
    %c0_i32 = arith.constant 0 : i32
    %c0_i32_0 = arith.constant 0 : i32
    return %arg1, %c0_i32 : i32, i32
  }
  func.func @transform_12(%arg0: i32, %arg1: i32) -> (i32, i32) {
    %c0_i32 = arith.constant 0 : i32
    %c0_i32_0 = arith.constant 0 : i32
    %c0_i32_1 = arith.constant 0 : i32
    return %c0_i32, %c0_i32_0 : i32, i32
  }
  func.func @transform_13(%arg0: i32, %arg1: i32) -> (i32, i32, i32) {
    %c0_i32 = arith.constant 0 : i32
    %c0_i32_0 = arith.constant 0 : i32
    %c0_i32_1 = arith.constant 0 : i32
    return %arg0, %c0_i32, %c0_i32_0 : i32, i32, i32
  }
}

</mosaic_0001>

<bundles_post_ra>
// kernel: tpu_custom_call.1
= control target key start
LH: loop header
LB: loop body
LE: loop exit
PB: predicated region body
PF: predicated region fallthrough
CT: control target
= control target key end

     0   :  { %s4905_s0 = inlined_call_operand.hbm [shape: f32[2,64,256], index: 0, kind: input, shape index: {}]   ;;  %s4906_s1 = inlined_call_operand.hbm [shape: f32[1,256], index: 1, kind: input, shape index: {}]   ;;  %s4907_s2 = inlined_call_operand.hbm [shape: f32[64,256], index: 2, kind: input, shape index: {}]   ;;  %s4908_s3 = inlined_call_operand.hbm [shape: f32[128,4], index: 3, kind: input, shape index: {}]   ;;  %s4909_s4 = inlined_call_operand.hbm [shape: f32[4,128], index: 4, kind: input, shape index: {}]   ;;  %s4910_s5 = inlined_call_operand.hbm [shape: bf16[256,256], index: 5, kind: input, shape index: {}]   ;;  %s4911_s6 = inlined_call_operand.hbm [shape: f32[1,256], index: 6, kind: input, shape index: {}]   ;;  %s4912_s7 = inlined_call_operand.hbm [shape: bf16[256,256], index: 7, kind: input, shape index: {}]   ;;  %s4913_s8 = inlined_call_operand.hbm [shape: f32[1,256], index: 8, kind: input, shape index: {}]   ;;  %s4914_s9 = inlined_call_operand.hbm [shape: bf16[256,256], index: 9, kind: input, shape index: {}]   ;;  %s4915_s10 = inlined_call_operand.hbm [shape: f32[1,256], index: 10, kind: input, shape index: {}]   ;;  %s4916_s11 = inlined_call_operand.hbm [shape: bf16[256,128], index: 11, kind: input, shape index: {}]   ;;  %s4917_s12 = inlined_call_operand.hbm [shape: f32[1,128], index: 12, kind: input, shape index: {}]   ;;  %s4918_s13 = inlined_call_operand.hbm [shape: f32[2,1,128], index: 13, kind: output, shape index: {}]  }
   0x1   :  { %4961 = sst [smem:[#allocation46_spill]] %s4905_s0 }
   0x2   :  { %4962 = sst [smem:[#allocation47_spill]] %s4906_s1 }
   0x3   :  { %4963 = sst [smem:[#allocation48_spill]] %s4907_s2 }
   0x4   :  { %4964 = sst [smem:[#allocation49_spill]] %s4908_s3 }
   0x5   :  { %4965 = sst [smem:[#allocation50_spill]] %s4909_s4 }
   0x6   :  { %4966 = sst [smem:[#allocation51_spill]] %s4910_s5 }
   0x7   :  { %4967 = sst [smem:[#allocation52_spill]] %s4911_s6 }
   0x8   :  { %4968 = sst [smem:[#allocation53_spill]] %s4912_s7 }
   0x9   :  { %4969 = sst [smem:[#allocation54_spill]] %s4913_s8 }
   0xa   :  { %4970 = sst [smem:[#allocation55_spill]] %s4914_s9 }
   0xb   :  { %4971 = sst [smem:[#allocation56_spill]] %s4915_s10 }
   0xc   :  { %4972 = sst [smem:[#allocation57_spill]] %s4916_s11 }
   0xd   :  { %4973 = sst [smem:[#allocation58_spill]] %s4917_s12 }
   0xe   :  { %4974 = sst [smem:[#allocation59_spill]] %s4918_s13 }
   0xf   :  { %18 = vsyncpa [#allocation5], 0 }
  0x10   :  { %20 = vsyncpa [#allocation5 + $0x1], 0 }
  0x11   :  { %21 = vsyncpa [#allocation8], 0 }
  0x12   :  { %22 = vsyncpa [#allocation11], 0 }
  0x13   :  { %23 = vsyncpa [#allocation14], 0 }
  0x14   :  { %25 = vsyncpa [#allocation14 + $0x1], 0 }
  0x15   :  { %26 = vsyncpa [#allocation17], 0 }
  0x16   :  { %28 = vsyncpa [#allocation17 + $0x1], 0 }
  0x17   :  { %29 = vsyncpa [#allocation20], 0 }
  0x18   :  { %31 = vsyncpa [#allocation20 + $0x1], 0 }
  0x19   :  { %32 = vsyncpa [#allocation23], 0 }
  0x1a   :  { %34 = vsyncpa [#allocation23 + $0x1], 0 }
  0x1b   :  { %35 = vsyncpa [#allocation6], 0 }
  0x1c   :  { %37 = vsyncpa [#allocation6 + $0x1], 0  ;;  %s3921_s25 = smov 0   ;;  %s3923_s26 = smov 0  }
  0x1d   :  { %s3925_s27 = smov 0   ;;  %s3927_s28 = smov 0  }
  0x1e   :  { %s3929_s29 = smov 0   ;;  %s3931_s30 = smov 0  }
  0x1f   :  { %s3933_s14 = smov 0   ;;  %s3935_s15 = smov 0  }
  0x20   :  { %s3937_s16 = smov 0   ;;  %s3939_s17 = smov 0  }
  0x21   :  { %s3941_s18 = smov 0  }
  0x22 LB: > { %4975 = sst [smem:[#allocation35_spill]] %s3788_s26  ;;  %s3975_s19 = sadd.s32 4294967295, %s3824_s18   ;;  %s3824_s18 = sphi %s3941_s18, %s43_s18   ;;  %s3820_s17 = sphi %s3939_s17, %s5056_s17   ;;  %s3816_s16 = sphi %s3937_s16, %s5062_s16   ;;  %s3812_s15 = sphi %s3935_s15, %s5054_s15   ;;  %s3808_s14 = sphi %s3933_s14, %s5061_s14   ;;  %s3804_s30 = sphi %s3931_s30, %s5060_s30   ;;  %s3800_s29 = sphi %s3929_s29, %s5059_s29   ;;  %s3796_s28 = sphi %s3927_s28, %s5058_s28   ;;  %s3792_s27 = sphi %s3925_s27, %s5057_s27   ;;  %s3788_s26 = sphi %s3923_s26, %s5052_s26   ;;  %s3784_s25 = sphi %s3921_s25, %s5051_s25  }
  0x23   : > { %4976 = sst [smem:[#allocation36_spill]] %s3792_s27  ;;  %p185_p0 = scmp.ne.s32.totalorder %s3788_s26, %s3784_s25 }
  0x24   : > { %4977 = sst [smem:[#allocation37_spill]] %s3808_s14  ;;  %p4926_p1 = scmp.eq.s32.totalorder %s3975_s19, 0 }
  0x25   : > { %4978 = sst [smem:[#allocation38_spill]] %s3812_s15  ;;  %p2530_p2 = scmp.ge.s32.totalorder %s3824_s18, 1 }
  0x26   : > { %4979 = sst [smem:[#allocation39_spill]] %s3820_s17  ;;  %p399_p3 = scmp.lt.s32.totalorder %s3824_s18, 5 }
  0x27   : > { %p3983_p4 = por %p185_p0, %p4926_p1  ;;  %s3826_s22 = smov [#allocation7]  }
  0x28   : > { %p3987_p5 = pnand %p2530_p2, %p399_p3  ;;  %s412_s23 = sshll.u32 %s3826_s22, 4  ;;  %s413_s23 = int_to_ptr.vmem [resolvable:$true] %s412_s23 }
  0x29   : > { %s4980_s20 = scalar_select %p3983_p4, 1, 0 }
  0x2a   : > { %s4982_s21 = scalar_select %p3987_p5, 1, 0 }
  0x2b   : > { %4981 = sst [smem:[#allocation40_spill]] %s4980_s20  ;;  %p3057_p6 = pneg %p3987_p5 }
  0x2c   : > { %4983 = sst [smem:[#allocation41_spill]] %s4982_s21  ;;  %s3827_s24 = smov [#allocation10]  }
  0x2d   : > { %s435_s25 = sshll.u32 %s3827_s24, 4  ;;  %p3995_p7 = pnand %p3057_p6, %p4926_p1  ;;  %s3999_s25 = int_to_ptr.vmem [resolvable:$true] %s435_s25 }
  0x2e   : > { %s3828_s15 = smov [#allocation24]   ;;  %s4985_s1 = sld [smem:[#allocation47_spill]] }
  0x2f   : > { %s4984_s13 = scalar_select %p3995_p7, 1, 0 }
  0x30   : > { %s4001_s14 = sshll.u32 %s3828_s15, 4  ;;  %p4011_p9 = pneg %p3995_p7  ;;  %s461_s14 = int_to_ptr.vmem [resolvable:$true] %s4001_s14 }
  0x32   : > { %s4986_s24 = scalar_select %p4011_p9, 1, 0 }
  0x34   : > { %s3294_s22 = scalar_lea.hbm %s4985_s1, 32 }
  0x35   : > { %p3295_p8 = scmp.ne.s32.totalorder %s4985_s1, %s3294_s22  ;;  %p3301_p12 = scmp.lt.u32.totalorder %s3294_s22, %s4985_s1 }
  0x37   : > { %p3297_p10 = pnand %p4011_p9, %p3295_p8 }
  0x39   : > { %p3298_p11 = pneg %p3297_p10 }
  0x3b   : > { %p3303_p13 = pnand %p3301_p12, %p3298_p11 }
  0x3d   : > { %3306 = shalt.err (!%p3303_p13)
}
  0x3e   : > { %s3307_s11 = scalar_lea.vmem %s413_s23, 32  ;;  %p3315_p6 = scmp.lt.s32.totalorder %s413_s23, %s413_s23 }
  0x3f   : > { %p3308_p0 = scmp.ne.s32.totalorder %s413_s23, %s3307_s11  ;;  %p3316_p1 = scmp.lt.s32.totalorder %s3307_s11, %s3307_s11 }
  0x41   : > { %p3310_p2 = pnand %p3308_p0, %p4011_p9  ;;  %p3317_p4 = por %p3316_p1, %p3315_p6 }
  0x43   : > { %p3311_p3 = pneg %p3310_p2 }
  0x45   : > { %p3318_p5 = pnand %p3317_p4, %p3311_p3 }
  0x47   : > { %3321 = shalt.err (!%p3318_p5)
}
  0x48   : > { %3060 = dma.hbm_to_vmem [thread:$0]  (!%p3995_p7), %s4985_s1, 32, %s413_s23, [#allocation8]  }
  0x49   : > { %s4987_s3 = sld [smem:[#allocation49_spill]] }
  0x4f   : > { %s3322_s22 = scalar_lea.hbm %s4987_s3, 2048 }
  0x50   : > { %p3323_p8 = scmp.ne.s32.totalorder %s4987_s3, %s3322_s22  ;;  %p3329_p4 = scmp.lt.u32.totalorder %s3322_s22, %s4987_s3 }
  0x52   : > { %p3325_p10 = pnand %p3323_p8, %p4011_p9 }
  0x54   : > { %p3326_p1 = pneg %p3325_p10 }
  0x56   : > { %p3331_p5 = pnand %p3329_p4, %p3326_p1 }
  0x58   : > { %3334 = shalt.err (!%p3331_p5)
}
  0x59   : > { %s3335_s23 = scalar_lea.vmem %s3999_s25, 2048  ;;  %p3343_p0 = scmp.lt.s32.totalorder %s3999_s25, %s3999_s25 }
  0x5a   : > { %p3336_p11 = scmp.ne.s32.totalorder %s3999_s25, %s3335_s23  ;;  %p3344_p2 = scmp.lt.s32.totalorder %s3335_s23, %s3335_s23 }
  0x5c   : > { %p3338_p12 = pnand %p3336_p11, %p4011_p9  ;;  %p3345_p3 = por %p3344_p2, %p3343_p0 }
  0x5e   : > { %p3339_p13 = pneg %p3338_p12 }
  0x60   : > { %p3346_p6 = pnand %p3345_p3, %p3339_p13 }
  0x62   : > { %3349 = shalt.err (!%p3346_p6)
}
  0x63   : > { %s4931_s6 = smov 128   ;;  %s3830_s0 = smov 8  }
  0x64   : > { %3066 = dma.hbm_to_vmem [thread:$0]  (!%p3995_p7), %s4987_s3, 2048, %s3999_s25, [#allocation11], %s4931_s6, %s4931_s6, %s3830_s0  }
  0x65   : > { %s4988_s12 = sld [smem:[#allocation58_spill]] }
  0x6b   : > { %s3350_s22 = scalar_lea.hbm %s4988_s12, 16 }
  0x6c   : > { %p3351_p8 = scmp.ne.s32.totalorder %s4988_s12, %s3350_s22  ;;  %p3357_p4 = scmp.lt.u32.totalorder %s3350_s22, %s4988_s12 }
  0x6e   : > { %p3353_p10 = pnand %p3351_p8, %p4011_p9 }
  0x70   : > { %p3354_p1 = pneg %p3353_p10 }
  0x72   : > { %p3359_p5 = pnand %p3357_p4, %p3354_p1 }
  0x74   : > { %3362 = shalt.err (!%p3359_p5)
}
  0x75   : > { %s3363_s10 = scalar_lea.vmem %s461_s14, 16  ;;  %s3370_s25 = scalar_lea.vmem %s461_s14, 32 }
  0x76   : > { %p3364_p11 = scmp.ne.s32.totalorder %s461_s14, %s3363_s10  ;;  %p3371_p0 = scmp.lt.s32.totalorder %s461_s14, %s461_s14 }
  0x77   : > { %p3372_p2 = scmp.lt.s32.totalorder %s3370_s25, %s3363_s10 }
  0x78   : > { %p3366_p12 = pnand %p3364_p11, %p4011_p9 }
  0x79   : > { %p3373_p3 = por %p3372_p2, %p3371_p0 }
  0x7a   : > { %p3367_p13 = pneg %p3366_p12 }
  0x7c   : > { %p3374_p6 = pnand %p3373_p3, %p3367_p13 }
  0x7e   : > { %3377 = shalt.err (!%p3374_p6)
}
  0x7f   : > { %3072 = dma.hbm_to_vmem [thread:$0]  (!%p3995_p7), %s4988_s12, 16, %s461_s14, [#allocation23]  }
  0x80   : > { %p4934_p8 = scmp.eq.s32.totalorder %s3824_s18, 0  ;;  %p179_p10 = scmp.ne.s32.totalorder %s3792_s27, %s3788_s26 }
  0x81   : > { %p4933_p1 = scmp.lt.s32.totalorder %s3824_s18, 4  ;;  %s4077_s8 = sand.u32 1, %s3824_s18  }
  0x82   : > { %p181_p4 = por %p179_p10, %p4934_p8  ;;  %s4082_s21 = sand.u32 1, %s3792_s27  }
  0x83   : > { %4989 = sst [smem:[#allocation42_spill]] %s4082_s21  ;;  %s4085_s22 = sshll.u32 %s3816_s16, 6 }
  0x84   : > { %s4088_s15 = sshll.u32 %s4082_s21, 7  ;;  %s4990_s5 = sld [smem:[#allocation51_spill]] }
  0x85   : > { %p4098_p5 = pnand %p4933_p1, %p181_p4  ;;  %s496_s25 = scalar_lea.vmem [#allocation13], %s4088_s15 }
  0x86   : > { %s502_s0 = sshll.u32 %s496_s25, 4  ;;  %s4103_s0 = int_to_ptr.vmem [resolvable:$true] %s502_s0 }
  0x87   : > { %s4991_s10 = scalar_select %p4098_p5, 1, 0 }
  0x88   : > { %p4110_p12 = pneg %p4098_p5 }
  0x8a   : > { %s4094_s14 = scalar_lea.hbm %s4990_s5, %s4085_s22  ;;  %s3383_s3 = scalar_lea.hbm %s4990_s5, 4096 }
  0x8b   : > { %s3378_s1 = scalar_lea.hbm %s4094_s14, 2048  ;;  %p3384_p2 = scmp.lt.u32.totalorder %s4094_s14, %s4990_s5 }
  0x8c   : > { %p3379_p11 = scmp.ne.s32.totalorder %s4094_s14, %s3378_s1  ;;  %p3385_p3 = scmp.lt.u32.totalorder %s3383_s3, %s3378_s1 }
  0x8d   : > { %s4992_s11 = scalar_select %p4110_p12, 1, 0 }
  0x8e   : > { %p3381_p13 = pnand %p4110_p12, %p3379_p11  ;;  %p3386_p6 = por %p3385_p3, %p3384_p2 }
  0x8f   : > { %p3387_p10 = scmp.lt.u32.totalorder %s3378_s1, %s4094_s14 }
  0x90   : > { %p3382_p0 = pneg %p3381_p13 }
  0x91   : > { %p3388_p4 = por %p3387_p10, %p3386_p6 }
  0x93   : > { %p3389_p1 = pnand %p3388_p4, %p3382_p0 }
  0x95   : > { %3392 = shalt.err (!%p3389_p1)
}
  0x96   : > { %s3393_s20 = scalar_lea.vmem %s4103_s0, 2048  ;;  %s3831_s6 = smov [#allocation13]  }
  0x97   : > { %p3394_p11 = scmp.ne.s32.totalorder %s4103_s0, %s3393_s20  ;;  %s3398_s23 = sshll.u32 %s3831_s6, 4  ;;  %s3399_s23 = int_to_ptr.vmem [resolvable:$false] %s3398_s23 }
  0x98   : > { %s3400_s12 = scalar_lea.vmem %s3399_s23, 4096  ;;  %p3401_p7 = scmp.lt.s32.totalorder %s4103_s0, %s3399_s23 }
  0x99   : > { %p3396_p13 = pnand %p3394_p11, %p4110_p12  ;;  %p3402_p9 = scmp.lt.s32.totalorder %s3400_s12, %s3393_s20 }
  0x9b   : > { %p3397_p8 = pneg %p3396_p13  ;;  %p3403_p2 = por %p3402_p9, %p3401_p7 }
  0x9d   : > { %p3404_p3 = pnand %p3403_p2, %p3397_p8 }
  0x9f   : > { %3407 = shalt.err (!%p3404_p3)
}
  0xa0   : > { %s4947_s3 = smov 64   ;;  %s4948_s1 = smov 4  }
  0xa1   : > { %s4993_s25 = smov 128   ;;  %s4994_s6 = scalar_lea.sflag [#allocation14], %s4077_s8 }
  0xa2   : > { %3079 = dma.hbm_to_vmem [thread:$0]  (!%p4098_p5), %s4094_s14, 2048, %s4103_s0, %s4994_s6, %s4993_s25, %s4947_s3, %s4948_s1  }
  0xa3   : > { %s4995_s7 = sld [smem:[#allocation53_spill]]  ;;  %s533_s5 = scalar_lea.vmem [#allocation16], %s4088_s15 }
  0xa4   : > { %s539_s26 = sshll.u32 %s533_s5, 4  ;;  %s4944_s21 = scalar_lea.sflag [#allocation17], %s4077_s8  ;;  %s4145_s26 = int_to_ptr.vmem [resolvable:$true] %s539_s26 }
  0xa9   : > { %s4142_s12 = scalar_lea.hbm %s4995_s7, %s4085_s22  ;;  %s3413_s6 = scalar_lea.hbm %s4995_s7, 4096 }
  0xaa   : > { %s3408_s27 = scalar_lea.hbm %s4142_s12, 2048  ;;  %p3414_p1 = scmp.lt.u32.totalorder %s4142_s12, %s4995_s7 }
  0xab   : > { %p3409_p7 = scmp.ne.s32.totalorder %s4142_s12, %s3408_s27  ;;  %p3415_p0 = scmp.lt.u32.totalorder %s3413_s6, %s3408_s27 }
  0xac   : > { %p3417_p10 = scmp.lt.u32.totalorder %s3408_s27, %s4142_s12 }
  0xad   : > { %p3411_p9 = pnand %p3409_p7, %p4110_p12  ;;  %p3416_p6 = por %p3415_p0, %p3414_p1 }
  0xaf   : > { %p3412_p8 = pneg %p3411_p9  ;;  %p3418_p4 = por %p3417_p10, %p3416_p6 }
  0xb1   : > { %p3419_p11 = pnand %p3418_p4, %p3412_p8 }
  0xb3   : > { %3422 = shalt.err (!%p3419_p11)
}
  0xb4   : > { %s3423_s5 = scalar_lea.vmem %s4145_s26, 2048  ;;  %s3834_s14 = smov [#allocation16]  }
  0xb5   : > { %p3424_p13 = scmp.ne.s32.totalorder %s4145_s26, %s3423_s5  ;;  %s3428_s0 = sshll.u32 %s3834_s14, 4  ;;  %s3429_s0 = int_to_ptr.vmem [resolvable:$false] %s3428_s0 }
  0xb6   : > { %s3430_s20 = scalar_lea.vmem %s3429_s0, 4096  ;;  %p3431_p7 = scmp.lt.s32.totalorder %s4145_s26, %s3429_s0 }
  0xb7   : > { %p3426_p2 = pnand %p3424_p13, %p4110_p12  ;;  %p3432_p9 = scmp.lt.s32.totalorder %s3430_s20, %s3423_s5 }
  0xb9   : > { %p3427_p3 = pneg %p3426_p2  ;;  %p3433_p1 = por %p3432_p9, %p3431_p7 }
  0xbb   : > { %p3434_p0 = pnand %p3433_p1, %p3427_p3 }
  0xbd   : > { %3437 = shalt.err (!%p3434_p0)
}
  0xbe   : > { %3085 = dma.hbm_to_vmem [thread:$0]  (!%p4098_p5), %s4142_s12, 2048, %s4145_s26, %s4944_s21, %s4993_s25, %s4947_s3, %s4948_s1  }
  0xbf   : > { %s4996_s9 = sld [smem:[#allocation55_spill]]  ;;  %s570_s5 = scalar_lea.vmem [#allocation19], %s4088_s15 }
  0xc0   : > { %s576_s14 = sshll.u32 %s570_s5, 4  ;;  %s4951_s0 = scalar_lea.sflag [#allocation20], %s4077_s8  ;;  %s4181_s14 = int_to_ptr.vmem [resolvable:$true] %s576_s14 }
  0xc5   : > { %s4178_s23 = scalar_lea.hbm %s4996_s9, %s4085_s22  ;;  %s3443_s27 = scalar_lea.hbm %s4996_s9, 4096 }
  0xc6   : > { %s3438_s20 = scalar_lea.hbm %s4178_s23, 2048  ;;  %p3444_p4 = scmp.lt.u32.totalorder %s4178_s23, %s4996_s9 }
  0xc7   : > { %p3439_p8 = scmp.ne.s32.totalorder %s4178_s23, %s3438_s20  ;;  %p3445_p11 = scmp.lt.u32.totalorder %s3443_s27, %s3438_s20 }
  0xc8   : > { %p3447_p2 = scmp.lt.u32.totalorder %s3438_s20, %s4178_s23 }
  0xc9   : > { %p3441_p6 = pnand %p3439_p8, %p4110_p12  ;;  %p3446_p13 = por %p3445_p11, %p3444_p4 }
  0xcb   : > { %p3442_p10 = pneg %p3441_p6  ;;  %p3448_p3 = por %p3447_p2, %p3446_p13 }
  0xcd   : > { %p3449_p7 = pnand %p3448_p3, %p3442_p10 }
  0xcf   : > { %3452 = shalt.err (!%p3449_p7)
}
  0xd0   : > { %s3453_s15 = scalar_lea.vmem %s4181_s14, 2048  ;;  %s3835_s5 = smov [#allocation19]  }
  0xd1   : > { %p3454_p9 = scmp.ne.s32.totalorder %s4181_s14, %s3453_s15  ;;  %s3458_s26 = sshll.u32 %s3835_s5, 4  ;;  %s3459_s26 = int_to_ptr.vmem [resolvable:$false] %s3458_s26 }
  0xd2   : > { %s3460_s12 = scalar_lea.vmem %s3459_s26, 4096  ;;  %p3461_p8 = scmp.lt.s32.totalorder %s4181_s14, %s3459_s26 }
  0xd3   : > { %p3456_p1 = pnand %p3454_p9, %p4110_p12  ;;  %p3462_p6 = scmp.lt.s32.totalorder %s3460_s12, %s3453_s15 }
  0xd5   : > { %p3457_p0 = pneg %p3456_p1  ;;  %p3463_p4 = por %p3462_p6, %p3461_p8 }
  0xd7   : > { %p3464_p11 = pnand %p3463_p4, %p3457_p0 }
  0xd9   : > { %3467 = shalt.err (!%p3464_p11)
}
  0xda   : > { %3091 = dma.hbm_to_vmem [thread:$0]  (!%p4098_p5), %s4178_s23, 2048, %s4181_s14, %s4951_s0, %s4993_s25, %s4947_s3, %s4948_s1  }
  0xdb   : > { %s3836_s20 = smov [#allocation9]   ;;  %s4997_s2 = sld [smem:[#allocation48_spill]] }
  0xdc   : > { %s422_s27 = sshll.u32 %s3836_s20, 4  ;;  %p4998_p13 = scmp.ne.s32.totalorder %s4986_s24, 0  ;;  %s423_s27 = int_to_ptr.vmem [resolvable:$true] %s422_s27 }
  0xe1   : > { %s3468_s15 = scalar_lea.hbm %s4997_s2, 2048 }
  0xe2   : > { %p3469_p10 = scmp.ne.s32.totalorder %s4997_s2, %s3468_s15  ;;  %p3475_p7 = scmp.lt.u32.totalorder %s3468_s15, %s4997_s2 }
  0xe4   : > { %p3471_p2 = pnand %p3469_p10, %p4998_p13 }
  0xe6   : > { %p3472_p3 = pneg %p3471_p2 }
  0xe8   : > { %p3477_p9 = pnand %p3475_p7, %p3472_p3 }
  0xea   : > { %3480 = shalt.err (!%p3477_p9)
}
  0xeb   : > { %s3481_s25 = scalar_lea.vmem %s423_s27, 2048  ;;  %p3489_p6 = scmp.lt.s32.totalorder %s423_s27, %s423_s27 }
  0xec   : > { %p3482_p1 = scmp.ne.s32.totalorder %s423_s27, %s3481_s25  ;;  %p3490_p4 = scmp.lt.s32.totalorder %s3481_s25, %s3481_s25 }
  0xee   : > { %p3484_p0 = pnand %p3482_p1, %p4998_p13  ;;  %p3491_p11 = por %p3490_p4, %p3489_p6 }
  0xf0   : > { %p3485_p8 = pneg %p3484_p0 }
  0xf2   : > { %p3492_p5 = pnand %p3491_p11, %p3485_p8 }
  0xf4   : > { %3495 = shalt.err (!%p3492_p5)
}
  0xf5   : > { %s4952_s23 = smov 256   ;;  %s4953_s14 = smov 16  }
  0xf6   : > { %p4999_p10 = scmp.ne.s32.totalorder %s4984_s13, 0  ;;  %s3839_s22 = smov [#allocation12]  }
  0xf7   : > { %s449_s6 = sshll.u32 %s3839_s22, 4  ;;  %s5000_s4 = sld [smem:[#allocation50_spill]]  ;;  %s450_s6 = int_to_ptr.vmem [resolvable:$true] %s449_s6 }
  0xf8   : > { %3063 = dma.hbm_to_vmem [thread:$0]  (!%p4999_p10), %s4997_s2, 2048, %s423_s27, [#allocation8], %s4952_s23, %s4952_s23, %s4953_s14  }
  0xfd   : > { %s3496_s26 = scalar_lea.hbm %s5000_s4, 64 }
  0xfe   : > { %p3497_p5 = scmp.ne.s32.totalorder %s5000_s4, %s3496_s26  ;;  %p3503_p7 = scmp.lt.u32.totalorder %s3496_s26, %s5000_s4 }
 0x100   : > { %p3499_p2 = pnand %p3497_p5, %p4998_p13 }
 0x102   : > { %p3500_p3 = pneg %p3499_p2 }
 0x104   : > { %p3505_p9 = pnand %p3503_p7, %p3500_p3 }
 0x106   : > { %3508 = shalt.err (!%p3505_p9)
}
 0x107   : > { %s3509_s27 = scalar_lea.vmem %s450_s6, 64  ;;  %p3517_p6 = scmp.lt.s32.totalorder %s450_s6, %s450_s6 }
 0x108   : > { %p3510_p1 = scmp.ne.s32.totalorder %s450_s6, %s3509_s27  ;;  %p3518_p4 = scmp.lt.s32.totalorder %s3509_s27, %s3509_s27 }
 0x10a   : > { %p3512_p0 = pnand %p3510_p1, %p4998_p13  ;;  %p3519_p11 = por %p3518_p4, %p3517_p6 }
 0x10c   : > { %p3513_p8 = pneg %p3512_p0 }
 0x10e   : > { %p3520_p12 = pnand %p3519_p11, %p3513_p8 }
 0x110   : > { %3523 = shalt.err (!%p3520_p12)
}
 0x111   : > { %3069 = dma.hbm_to_vmem [thread:$0]  (!%p4999_p10), %s5000_s4, 64, %s450_s6, [#allocation11]  }
 0x112   : > { %s2529_s13 = sadd.s32 4294967294, %s3824_s18   ;;  %s5001_s24 = sld [smem:[#allocation36_spill]] }
 0x113   : > { %s52_s3 = sadd.s32 1, %s3816_s16  ;;  %s55_s1 = sadd.s32 1, %s3820_s17 }
 0x114   : > { %p53_p12 = scmp.ge.s32.totalorder %s52_s3, 2  ;;  %s62_s22 = sadd.s32 1, %s3804_s30 }
 0x115   : > { %p69_p13 = scmp.ne.s32.totalorder %s3804_s30, %s3800_s29  ;;  %p75_p5 = scmp.ne.s32.totalorder %s3800_s29, %s3796_s28 }
 0x116   : > { %s5064_s3 = smov (%p53_p12, %s52_s3), 0  ;;  %s5066_s1 = smov (!%p53_p12, %s55_s1), %s3820_s17 }
 0x117   : > { %5002 = sst [smem:[#allocation43_spill]] %s5064_s3  ;;  %p5003_p10 = scmp.eq.s32.totalorder %s3824_s18, 0 }
 0x118   : > { %p5005_p3 = scmp.eq.s32.totalorder %s3975_s19, 0  ;;  %p57_p9 = scmp.ge.s32.totalorder %s5066_s1, 2 }
 0x119   : > { %p4265_p2 = por %p5003_p10, %p69_p13  ;;  %s169_s5 = ssub.s32 %s3816_s16, %s5064_s3 }
 0x11a   : > { %p4274_p7 = por %p5005_p3, %p75_p5  ;;  %p170_p1 = scmp.eq.s32.totalorder %s169_s5, 0 }
 0x11b   : > { %p386_p0 = scmp.eq.s32.totalorder %s3975_s19, 3  ;;  %s5068_s1 = smov (%p57_p9, %s5066_s1), 0 }
 0x11c   : > { %s5006_s15 = scalar_select %p4274_p7, 1, 0 }
 0x11d   : > { %5007 = sst [smem:[#allocation44_spill]] %s5068_s1  ;;  %s5008_s26 = sadd.s32 1, %s5001_s24 }
 0x11e   : > { %s5070_s24 = smov (!%p170_p1, %s5001_s24), %s5008_s26  ;;  %s59_s12 = ssub.s32 %s3820_s17, %s5068_s1 }
 0x11f   : > { %p4293_p8 = por %p386_p0, %p69_p13  ;;  %p60_p6 = scmp.eq.s32.totalorder %s59_s12, 0 }
 0x120   : > { %p392_p4 = scmp.eq.s32.totalorder %s2529_s13, 3  ;;  %s471_s27 = sand.u32 1, %s3804_s30  }
 0x121   : > { %s5009_s25 = scalar_select %p4293_p8, 1, 0 }
 0x122   : > { %s2636_s21 = sshll.u32 %s3820_s17, 11  ;;  %p4305_p11 = por %p392_p4, %p75_p5 }
 0x123   : > { %s4300_s20 = scalar_select %p60_p6, %s3804_s30, %s62_s22  }
 0x124   : > { %s5011_s5 = scalar_select %p4305_p11, 1, 0 }
 0x125   : > { %5010 = sst [smem:[#allocation45_spill]] %s4300_s20  ;;  %s2537_s0 = sshll.u32 %s471_s27, 7 }
 0x126   : > { %s5012_s14 = sld [smem:[#allocation46_spill]]  ;;  %p5014_p12 = scmp.lt.s32.totalorder %s3824_s18, 4 }
 0x127   : > { %s475_s22 = scalar_lea.vmem [#allocation4], %s2537_s0  ;;  %s4324_s7 = scalar_lea.sflag [#allocation5], %s471_s27 }
 0x128   : > { %p4318_p13 = pnand %p5014_p12, %p4265_p2  ;;  %s482_s12 = sshll.u32 %s475_s22, 4  ;;  %s4322_s12 = int_to_ptr.vmem [resolvable:$true] %s482_s12 }
 0x12a   : > { %p3526_p10 = pneg %p4318_p13 }
 0x12c   : > { %s5013_s2 = smov %s5012_s14  ;;  %s4312_s4 = scalar_lea.hbm %s5012_s14, %s2636_s21 }
 0x12d   : > { %s3524_s23 = scalar_lea.hbm %s4312_s4, 2048  ;;  %s3529_s21 = scalar_lea.hbm %s5013_s2, 4096 }
 0x12e   : > { %p3525_p5 = scmp.ne.s32.totalorder %s4312_s4, %s3524_s23  ;;  %p3530_p2 = scmp.lt.u32.totalorder %s4312_s4, %s5013_s2 }
 0x12f   : > { %p3531_p1 = scmp.lt.u32.totalorder %s3529_s21, %s3524_s23  ;;  %p3533_p6 = scmp.lt.u32.totalorder %s3524_s23, %s4312_s4 }
 0x130   : > { %p3527_p3 = pnand %p3526_p10, %p3525_p5 }
 0x131   : > { %p3532_p0 = por %p3531_p1, %p3530_p2 }
 0x132   : > { %p3528_p9 = pneg %p3527_p3 }
 0x133   : > { %p3534_p4 = por %p3533_p6, %p3532_p0 }
 0x135   : > { %p3535_p12 = pnand %p3534_p4, %p3528_p9 }
 0x137   : > { %3538 = shalt.err (!%p3535_p12)
}
 0x138   : > { %s3539_s0 = scalar_lea.vmem %s4322_s12, 2048  ;;  %s3840_s27 = smov [#allocation4]  }
 0x139   : > { %p3540_p5 = scmp.ne.s32.totalorder %s4322_s12, %s3539_s0  ;;  %s3544_s22 = sshll.u32 %s3840_s27, 4  ;;  %s3545_s22 = int_to_ptr.vmem [resolvable:$false] %s3544_s22 }
 0x13a   : > { %s3546_s9 = scalar_lea.vmem %s3545_s22, 4096  ;;  %p3547_p8 = scmp.lt.s32.totalorder %s4322_s12, %s3545_s22 }
 0x13b   : > { %p3542_p3 = pnand %p3540_p5, %p3526_p10  ;;  %p3548_p2 = scmp.lt.s32.totalorder %s3546_s9, %s3539_s0 }
 0x13d   : > { %p3543_p11 = pneg %p3542_p3  ;;  %p3549_p1 = por %p3548_p2, %p3547_p8 }
 0x13f   : > { %p3550_p0 = pnand %p3549_p1, %p3543_p11 }
 0x141   : > { %3553 = shalt.err (!%p3550_p0)
}
 0x142   : > { %s5016_s23 = smov 16   ;;  %s5017_s14 = smov 256  }
 0x143   : > { %s5018_s6 = sld [smem:[#allocation42_spill]]  ;;  %s4356_s21 = sshll.u32 %s3816_s16, 4 }
 0x144   : > { %3076 = dma.hbm_to_vmem [thread:$0]  (!%p4318_p13), %s4312_s4, 2048, %s4322_s12, %s4324_s7, %s5017_s14, %s5017_s14, %s5016_s23  }
 0x145   : > { %s5019_s9 = sld [smem:[#allocation52_spill]]  ;;  %p5020_p11 = scmp.ne.s32.totalorder %s4992_s11, 0 }
 0x149   : > { %s515_s26 = scalar_lea.vmem [#allocation15], %s5018_s6 }
 0x14a   : > { %s522_s0 = sshll.u32 %s515_s26, 4  ;;  %s523_s0 = int_to_ptr.vmem [resolvable:$true] %s522_s0 }
 0x14b   : > { %s520_s2 = scalar_lea.hbm %s5019_s9, %s4356_s21  ;;  %s3559_s17 = scalar_lea.hbm %s5019_s9, 32 }
 0x14c   : > { %s3554_s13 = scalar_lea.hbm %s520_s2, 16  ;;  %p3560_p13 = scmp.lt.u32.totalorder %s520_s2, %s5019_s9 }
 0x14d   : > { %p3555_p8 = scmp.ne.s32.totalorder %s520_s2, %s3554_s13  ;;  %p3561_p6 = scmp.lt.u32.totalorder %s3559_s17, %s3554_s13 }
 0x14e   : > { %p3563_p12 = scmp.lt.u32.totalorder %s3554_s13, %s520_s2 }
 0x14f   : > { %p3557_p10 = pnand %p3555_p8, %p5020_p11  ;;  %p3562_p4 = por %p3561_p6, %p3560_p13 }
 0x151   : > { %p3558_p9 = pneg %p3557_p10  ;;  %p3564_p5 = por %p3563_p12, %p3562_p4 }
 0x153   : > { %p3565_p3 = pnand %p3564_p5, %p3558_p9 }
 0x155   : > { %3568 = shalt.err (!%p3565_p3)
}
 0x156   : > { %s3569_s12 = scalar_lea.vmem %s523_s0, 16  ;;  %s3841_s23 = smov [#allocation15]  }
 0x157   : > { %p3570_p2 = scmp.ne.s32.totalorder %s523_s0, %s3569_s12  ;;  %s3574_s14 = sshll.u32 %s3841_s23, 4  ;;  %s3575_s14 = int_to_ptr.vmem [resolvable:$false] %s3574_s14 }
 0x158   : > { %s3576_s3 = scalar_lea.vmem %s3575_s14, 32  ;;  %p3577_p8 = scmp.lt.s32.totalorder %s523_s0, %s3575_s14 }
 0x159   : > { %p3572_p1 = pnand %p3570_p2, %p5020_p11  ;;  %p3578_p10 = scmp.lt.s32.totalorder %s3576_s3, %s3569_s12 }
 0x15b   : > { %p3573_p0 = pneg %p3572_p1  ;;  %p3579_p7 = por %p3578_p10, %p3577_p8 }
 0x15d   : > { %p3580_p6 = pnand %p3579_p7, %p3573_p0 }
 0x15f   : > { %3583 = shalt.err (!%p3580_p6)
}
 0x160   : > { %p5021_p13 = scmp.ne.s32.totalorder %s4991_s10, 0  ;;  %s5022_s17 = scalar_lea.sflag [#allocation14], %s4077_s8 }
 0x161   : > { %s5023_s27 = sld [smem:[#allocation54_spill]]  ;;  %s552_s4 = scalar_lea.vmem [#allocation18], %s5018_s6 }
 0x162   : > { %3082 = dma.hbm_to_vmem [thread:$0]  (!%p5021_p13), %s520_s2, 16, %s523_s0, %s5022_s17  }
 0x163   : > { %s559_s7 = sshll.u32 %s552_s4, 4  ;;  %s5025_s14 = sld [smem:[#allocation56_spill]]  ;;  %s560_s7 = int_to_ptr.vmem [resolvable:$true] %s559_s7 }
 0x167   : > { %s5024_s22 = smov %s5023_s27  ;;  %s4381_s13 = scalar_lea.hbm %s5023_s27, %s4356_s21 }
 0x168   : > { %s3584_s20 = scalar_lea.hbm %s4381_s13, 16  ;;  %s3589_s17 = scalar_lea.hbm %s5024_s22, 32 }
 0x169   : > { %s5026_s3 = smov %s5025_s14  ;;  %s4388_s9 = scalar_lea.hbm %s5025_s14, %s4356_s21 }
 0x16a   : > { %p3585_p7 = scmp.ne.s32.totalorder %s4381_s13, %s3584_s20  ;;  %p3590_p12 = scmp.lt.u32.totalorder %s4381_s13, %s5024_s22 }
 0x16b   : > { %p3591_p5 = scmp.lt.u32.totalorder %s3589_s17, %s3584_s20  ;;  %p3593_p2 = scmp.lt.u32.totalorder %s3584_s20, %s4381_s13 }
 0x16c   : > { %p3587_p9 = pnand %p3585_p7, %p5020_p11 }
 0x16d   : > { %p3592_p3 = por %p3591_p5, %p3590_p12 }
 0x16e   : > { %p3588_p4 = pneg %p3587_p9 }
 0x16f   : > { %p3594_p1 = por %p3593_p2, %p3592_p3 }
 0x171   : > { %p3595_p0 = pnand %p3594_p1, %p3588_p4 }
 0x173   : > { %3598 = shalt.err (!%p3595_p0)
}
 0x174   : > { %s3599_s21 = scalar_lea.vmem %s560_s7, 16  ;;  %s3842_s27 = smov [#allocation18]  }
 0x175   : > { %p3600_p8 = scmp.ne.s32.totalorder %s560_s7, %s3599_s21  ;;  %s3604_s4 = sshll.u32 %s3842_s27, 4  ;;  %s3605_s4 = int_to_ptr.vmem [resolvable:$false] %s3604_s4 }
 0x176   : > { %s3606_s12 = scalar_lea.vmem %s3605_s4, 32  ;;  %p3607_p7 = scmp.lt.s32.totalorder %s560_s7, %s3605_s4 }
 0x177   : > { %p3602_p10 = pnand %p3600_p8, %p5020_p11  ;;  %p3608_p9 = scmp.lt.s32.totalorder %s3606_s12, %s3599_s21 }
 0x179   : > { %p3603_p6 = pneg %p3602_p10  ;;  %p3609_p13 = por %p3608_p9, %p3607_p7 }
 0x17b   : > { %p3610_p5 = pnand %p3609_p13, %p3603_p6 }
 0x17d   : > { %3613 = shalt.err (!%p3610_p5)
}
 0x17e   : > { %p5027_p12 = scmp.ne.s32.totalorder %s4991_s10, 0  ;;  %s5028_s20 = scalar_lea.sflag [#allocation17], %s4077_s8 }
 0x17f   : > { %s589_s23 = scalar_lea.vmem [#allocation21], %s5018_s6  ;;  %s2549_s2 = sshll.u32 %s5018_s6, 6 }
 0x180   : > { %3088 = dma.hbm_to_vmem [thread:$0]  (!%p5027_p12), %s4381_s13, 16, %s560_s7, %s5028_s20  }
 0x181   : > { %s596_s14 = sshll.u32 %s589_s23, 4  ;;  %s3614_s0 = scalar_lea.hbm %s4388_s9, 16  ;;  %s597_s14 = int_to_ptr.vmem [resolvable:$true] %s596_s14 }
 0x182   : > { %p3615_p13 = scmp.ne.s32.totalorder %s4388_s9, %s3614_s0  ;;  %s3619_s26 = scalar_lea.hbm %s5026_s3, 32 }
 0x183   : > { %p3620_p2 = scmp.lt.u32.totalorder %s4388_s9, %s5026_s3  ;;  %p3621_p1 = scmp.lt.u32.totalorder %s3619_s26, %s3614_s0 }
 0x184   : > { %p3617_p4 = pnand %p3615_p13, %p5020_p11  ;;  %p3623_p8 = scmp.lt.u32.totalorder %s3614_s0, %s4388_s9 }
 0x185   : > { %p3622_p0 = por %p3621_p1, %p3620_p2 }
 0x186   : > { %p3618_p3 = pneg %p3617_p4 }
 0x187   : > { %p3624_p10 = por %p3623_p8, %p3622_p0 }
 0x189   : > { %p3625_p6 = pnand %p3624_p10, %p3618_p3 }
 0x18b   : > { %3628 = shalt.err (!%p3625_p6)
}
 0x18c   : > { %s3629_s13 = scalar_lea.vmem %s597_s14, 16  ;;  %s3843_s7 = smov [#allocation21]  }
 0x18d   : > { %p3630_p7 = scmp.ne.s32.totalorder %s597_s14, %s3629_s13  ;;  %s3634_s4 = sshll.u32 %s3843_s7, 4  ;;  %s3635_s4 = int_to_ptr.vmem [resolvable:$false] %s3634_s4 }
 0x18e   : > { %s3636_s12 = scalar_lea.vmem %s3635_s4, 32  ;;  %p3637_p13 = scmp.lt.s32.totalorder %s597_s14, %s3635_s4 }
 0x18f   : > { %p3632_p9 = pnand %p3630_p7, %p5020_p11  ;;  %p3638_p4 = scmp.lt.s32.totalorder %s3636_s12, %s3629_s13 }
 0x191   : > { %p3633_p5 = pneg %p3632_p9  ;;  %p3639_p12 = por %p3638_p4, %p3637_p13 }
 0x193   : > { %p3640_p1 = pnand %p3639_p12, %p3633_p5 }
 0x195   : > { %3643 = shalt.err (!%p3640_p1)
}
 0x196   : > { %p5029_p2 = scmp.ne.s32.totalorder %s4991_s10, 0  ;;  %s5030_s20 = scalar_lea.sflag [#allocation20], %s4077_s8 }
 0x197   : > { %s2637_s23 = sshll.u32 %s3816_s16, 10  ;;  %s5031_s1 = sld [smem:[#allocation57_spill]] }
 0x198   : > { %3094 = dma.hbm_to_vmem [thread:$0]  (!%p5029_p2), %s4388_s9, 16, %s597_s14, %s5030_s20  }
 0x199   : > { %s607_s21 = scalar_lea.vmem [#allocation22], %s2549_s2  ;;  %s604_s13 = scalar_lea.sflag [#allocation23], %s4077_s8 }
 0x19a   : > { %s614_s27 = sshll.u32 %s607_s21, 4  ;;  %s4438_s27 = int_to_ptr.vmem [resolvable:$true] %s614_s27 }
 0x19d   : > { %s4434_s26 = scalar_lea.hbm %s5031_s1, %s2637_s23  ;;  %s3649_s4 = scalar_lea.hbm %s5031_s1, 2048 }
 0x19e   : > { %s3644_s7 = scalar_lea.hbm %s4434_s26, 1024  ;;  %p3650_p8 = scmp.lt.u32.totalorder %s4434_s26, %s5031_s1 }
 0x19f   : > { %p3645_p12 = scmp.ne.s32.totalorder %s4434_s26, %s3644_s7  ;;  %p3651_p10 = scmp.lt.u32.totalorder %s3649_s4, %s3644_s7 }
 0x1a0   : > { %p3653_p7 = scmp.lt.u32.totalorder %s3644_s7, %s4434_s26 }
 0x1a1   : > { %p3647_p3 = pnand %p3645_p12, %p5020_p11  ;;  %p3652_p6 = por %p3651_p10, %p3650_p8 }
 0x1a3   : > { %p3648_p0 = pneg %p3647_p3  ;;  %p3654_p9 = por %p3653_p7, %p3652_p6 }
 0x1a5   : > { %p3655_p5 = pnand %p3654_p9, %p3648_p0 }
 0x1a7   : > { %3658 = shalt.err (!%p3655_p5)
}
 0x1a8   : > { %s3659_s2 = scalar_lea.vmem %s4438_s27, 1024  ;;  %s3844_s20 = smov [#allocation22]  }
 0x1a9   : > { %p3660_p13 = scmp.ne.s32.totalorder %s4438_s27, %s3659_s2  ;;  %s3664_s23 = sshll.u32 %s3844_s20, 4  ;;  %s3665_s23 = int_to_ptr.vmem [resolvable:$false] %s3664_s23 }
 0x1aa   : > { %s3666_s0 = scalar_lea.vmem %s3665_s23, 2048  ;;  %p3667_p12 = scmp.lt.s32.totalorder %s4438_s27, %s3665_s23 }
 0x1ab   : > { %p3662_p4 = pnand %p3660_p13, %p5020_p11  ;;  %p3668_p3 = scmp.lt.s32.totalorder %s3666_s0, %s3659_s2 }
 0x1ad   : > { %p3663_p1 = pneg %p3662_p4  ;;  %p3669_p8 = por %p3668_p3, %p3667_p12 }
 0x1af   : > { %p3670_p10 = pnand %p3669_p8, %p3663_p1 }
 0x1b1   : > { %3673 = shalt.err (!%p3670_p10)
}
 0x1b2   : > { %s5032_s17 = smov 4   ;;  %s5033_s21 = smov 64  }
 0x1b3   : > { %3097 = dma.hbm_to_vmem [thread:$0]  (!%p5029_p2), %s4434_s26, 1024, %s4438_s27, %s604_s13, %s5033_s21, %s5033_s21, %s5032_s17  }
 0x1b4   : > { %s5034_s11 = sld [smem:[#allocation41_spill]] }
 0x1ba   : > { %p5035_p11 = scmp.ne.s32.totalorder %s5034_s11, 0 }
 0x1bb   : > { %s4470_s7 = sand.u32 (!%p5035_p11), 1, %s3800_s29   ;;  %p5036_p0 = scmp.ne.s32.totalorder (!%p5035_p11), %s5006_s15, 0 }
 0x1bc   : > { %626 = sbr.rel (%p5035_p11) target bundleno = 1610 (0x64a), region = 72  ;;  %s2553_s9 = sshll.u32 (!%p5035_p11), %s4470_s7, 7 }
 0x1bd   : > { %s629_s14 = scalar_lea.sflag (!%p5035_p11), [#allocation5], %s4470_s7  ;;  %s4474_s10 = scalar_lea.vmem (!%p5035_p11), [#allocation4], %s2553_s9 }
 0x1c3   : > { %3747 = dma.done.wait (%p5036_p0), %s629_s14, 2048  }
 0x1c4   : > { %3749 = vsyncadd (%p5036_p0), %s629_s14, 4294965248  ;;  %p5037_p2 = scmp.eq.s32.totalorder %s3975_s19, 0 }
 0x1c6   : > { %3751 = dma.done.wait (%p5037_p2), [#allocation8], 2080   ;;  %p5038_p6 = pmov %p5037_p2 }
 0x1c7   : > { %p5039_p7 = pmov %p5037_p2 }
 0x1c8   : > { %3753 = vsyncadd (%p5038_p6), [#allocation8], 4294965216 }
 0x1c9   : > { %3755 = dma.done.wait (%p5039_p7), [#allocation11], 2112   ;;  %p5040_p9 = pmov %p5037_p2 }
 0x1ca   : > { %s5041_s8 = sld [smem:[#allocation35_spill]]  ;;  %s653_s27 = sand.u32 1, %s3975_s19  }
 0x1cb   : > { %3757 = vsyncadd (%p5040_p9), [#allocation11], 4294965184  ;;  %s5042_s26 = sld [smem:[#allocation40_spill]]  ;;  %s654_s4 = scalar_lea.sflag [#allocation14], %s653_s27 }
 0x1d0   : > { %s4490_s13 = sand.u32 1, %s5041_s8  }
 0x1d1   : > { %s2558_s15 = sshll.u32 %s4490_s13, 7  ;;  %p5043_p5 = scmp.ne.s32.totalorder %s5042_s26, 0 }
 0x1d2   : > { %s4493_s12 = scalar_lea.vmem [#allocation13], %s2558_s15 }
 0x1d3   : > { %3759 = dma.done.wait (%p5043_p5), %s654_s4, 2064  }
 0x1d4   : > { %3761 = vsyncadd (%p5043_p5), %s654_s4, 4294965232  ;;  %s665_s6 = scalar_lea.vmem [#allocation15], %s4490_s13  ;;  %s671_s2 = scalar_lea.sflag [#allocation17], %s653_s27 }
 0x1d5   : > { %s4500_s20 = scalar_lea.vmem [#allocation16], %s2558_s15 }
 0x1d6   : > { %3763 = dma.done.wait (%p5043_p5), %s671_s2, 2064  }
 0x1d7   : > { %3765 = vsyncadd (%p5043_p5), %s671_s2, 4294965232  ;;  %s682_s23 = scalar_lea.vmem [#allocation18], %s4490_s13  ;;  %s688_s0 = scalar_lea.sflag [#allocation20], %s653_s27 }
 0x1d8   : > { %s4507_s17 = scalar_lea.vmem [#allocation19], %s2558_s15 }
 0x1d9   : > { %3767 = dma.done.wait (%p5043_p5), %s688_s0, 2064  }
 0x1da   : > { %3769 = vsyncadd (%p5043_p5), %s688_s0, 4294965232  ;;  %s2561_s21 = sshll.u32 %s4490_s13, 6  ;;  %s699_s11 = scalar_lea.vmem [#allocation21], %s4490_s13 }
 0x1db   : > { %s705_s9 = scalar_lea.sflag [#allocation23], %s653_s27  ;;  %s4515_s14 = scalar_lea.vmem [#allocation22], %s2561_s21 }
 0x1dc   : > { %3771 = dma.done.wait (%p5043_p5), %s705_s9, 1024  }
 0x1dd   : > { %3773 = vsyncadd (%p5043_p5), %s705_s9, 4294966272  ;;  %p5044_p13 = pmov %p5037_p2 }
 0x1de   : > { %p5045_p4 = pmov %p5037_p2 }
 0x1df   : > { %3775 = dma.done.wait (%p5044_p13), [#allocation23], 16  }
 0x1e0   : > { %3777 = vsyncadd (%p5045_p4), [#allocation23], 4294967280  ;;  %s4526_s8 = scalar_lea.vmem [#allocation25], %s4470_s7  ;;  %s5046_s15 = sld [smem:[#allocation37_spill]] }
 0x1e6   : > { %p2563_p1 = scmp.ne.s32.totalorder %s5046_s15, 0 }
 0x1e7   : > { %v792_v0 = vld [vmem:[%s4474_s10] sm:$0xff] (!%p2563_p1)  ;;  %v793_v1 = vld [vmem:[%s4474_s10 + $0x8] sm:$0xff] (!%p2563_p1)  ;;  %v794_v2 = vld [vmem:[%s4474_s10 + $0x10] sm:$0xff] (!%p2563_p1)  ;;  %v839_v27 = vlaneseq (!%p2563_p1)  ;;  %vm903_vm0 = vcmask (!%p2563_p1), 1040384   ;;  %vm904_vm1 = vsmask.f32 (!%p2563_p1), 256 }
 0x1e8   : > { %791 = sbr.rel (%p2563_p1) target bundleno = 527 (0x20f), region = 128  ;;  %v795_v3 = vld [vmem:[%s4474_s10 + $0x18] sm:$0xff] (!%p2563_p1)  ;;  %v796_v4 = vld [vmem:[%s4474_s10 + $0x20] sm:$0xff] (!%p2563_p1)  ;;  %v797_v5 = vld [vmem:[%s4474_s10 + $0x28] sm:$0xff] (!%p2563_p1)  ;;  %v808_v6 = vadd.f32 (!%p2563_p1), %v794_v2, %v792_v0  ;;  %vm906_vm2 = vcmask (!%p2563_p1), 1041409  }
 0x1e9   : > { %v798_v7 = vld [vmem:[%s4474_s10 + $0x30] sm:$0xff] (!%p2563_p1)  ;;  %v821_v8 = vadd.f32 (!%p2563_p1), %v795_v3, %v793_v1  ;;  %v799_v9 = vld [vmem:[%s4474_s10 + $0x38] sm:$0xff] (!%p2563_p1)  ;;  %v800_v11 = vld [vmem:[%s4474_s10 + $0x40] sm:$0xff] (!%p2563_p1)  ;;  %vm907_vm3 = vsmask.f32 (!%p2563_p1), 1280 }
 0x1ea   : > { %v809_v10 = vadd.f32 (!%p2563_p1), %v808_v6, %v796_v4  ;;  %v801_v13 = vld [vmem:[%s4474_s10 + $0x48] sm:$0xff] (!%p2563_p1)  ;;  %v802_v14 = vld [vmem:[%s4474_s10 + $0x50] sm:$0xff] (!%p2563_p1)  ;;  %v803_v16 = vld [vmem:[%s4474_s10 + $0x58] sm:$0xff] (!%p2563_p1) }
 0x1eb   : > { %v822_v12 = vadd.f32 (!%p2563_p1), %v821_v8, %v797_v5  ;;  %v804_v17 = vld [vmem:[%s4474_s10 + $0x60] sm:$0xff] (!%p2563_p1)  ;;  %v805_v20 = vld [vmem:[%s4474_s10 + $0x68] sm:$0xff] (!%p2563_p1)  ;;  %v853_v22 = vld [vmem:[#allocation9 + $0x10] sm:$0xff] (!%p2563_p1) }
 0x1ec   : > { %v810_v15 = vadd.f32 (!%p2563_p1), %v809_v10, %v798_v7  ;;  %v851_v19 = vld [vmem:[#allocation9] sm:$0xff] (!%p2563_p1)  ;;  %v852_v24 = vld [vmem:[#allocation9 + $0x8] sm:$0xff] (!%p2563_p1)  ;;  %v869_v28 = vadd.f32 (!%p2563_p1), %v853_v22, %v794_v2  ;;  %v854_v29 = vld [vmem:[#allocation9 + $0x18] sm:$0xff] (!%p2563_p1) }
 0x1ed   : > { %v823_v18 = vadd.f32 (!%p2563_p1), %v822_v12, %v799_v9  ;;  %v867_v23 = vadd.f32 (!%p2563_p1), %v851_v19, %v792_v0  ;;  %v806_v25 = vld [vmem:[%s4474_s10 + $0x70] sm:$0xff] (!%p2563_p1)  ;;  %v868_v30 = vadd.f32 (!%p2563_p1), %v852_v24, %v793_v1  ;;  %v855_v31 = vld [vmem:[#allocation9 + $0x20] sm:$0xff] (!%p2563_p1)  ;;  %v807_v33 = vld [vmem:[%s4474_s10 + $0x78] sm:$0xff] (!%p2563_p1)  ;;  %v870_v35 = vadd.f32 (!%p2563_p1), %v854_v29, %v795_v3 }
 0x1ee   : > { %v811_v21 = vadd.f32 (!%p2563_p1), %v810_v15, %v800_v11  ;;  %v857_v32 = vld [vmem:[#allocation9 + $0x30] sm:$0xff] (!%p2563_p1)  ;;  %v871_v36 = vadd.f32 (!%p2563_p1), %v855_v31, %v796_v4  ;;  %v856_v38 = vld [vmem:[#allocation9 + $0x28] sm:$0xff] (!%p2563_p1)  ;;  %v858_v39 = vld [vmem:[#allocation9 + $0x38] sm:$0xff] (!%p2563_p1) }
 0x1ef   : > { %v824_v26 = vadd.f32 %v823_v18, %v801_v13  ;;  %v873_v37 = vadd.f32 %v857_v32, %v798_v7  ;;  %v859_v40 = vld [vmem:[#allocation9 + $0x40] sm:$0xff]  ;;  %v913_v42 = vpack.c.bf16 %v869_v28, %v867_v23  ;;  %v872_v43 = vadd.f32 %v856_v38, %v797_v5  ;;  %v861_v45 = vld [vmem:[#allocation9 + $0x50] sm:$0xff]  ;;  %v860_v46 = vld [vmem:[#allocation9 + $0x48] sm:$0xff] }
 0x1f0   : > { %v812_v34 = vadd.f32 %v811_v21, %v802_v14  ;;  %v874_v44 = vadd.f32 %v858_v39, %v799_v9  ;;  %v862_v47 = vld [vmem:[#allocation9 + $0x58] sm:$0xff]  ;;  %v914_v49 = vpack.c.bf16 %v870_v35, %v868_v30  ;;  %v875_v51 = vadd.f32 %v859_v40, %v800_v11  ;;  %v863_v52 = vld [vmem:[#allocation9 + $0x60] sm:$0xff]  ;;  %v865_v53 = vld [vmem:[#allocation9 + $0x70] sm:$0xff] }
 0x1f1   : > { %v825_v41 = vadd.f32 %v824_v26, %v803_v16  ;;  %v915_v50 = vpack.c.bf16 %v873_v37, %v871_v36  ;;  %v864_v54 = vld [vmem:[#allocation9 + $0x68] sm:$0xff]  ;;  %921 = vst [vmem:[#allocation3] sm:$0xff] %v913_v42  ;;  %v877_v57 = vadd.f32 %v861_v45, %v802_v14  ;;  %v876_v58 = vadd.f32 %v860_v46, %v801_v13  ;;  %v866_v59 = vld [vmem:[#allocation9 + $0x78] sm:$0xff]  ;;  %vm905_vm4 = vmand %vm903_vm0, %vm904_vm1 }
 0x1f2   : > { %v813_v48 = vadd.f32 %v812_v34, %v804_v17  ;;  %v916_v56 = vpack.c.bf16 %v874_v44, %v872_v43  ;;  %v929_v60 = vld [vmem:[#allocation24] sm:$0x1]  ;;  %922 = vst [vmem:[#allocation3 + $0x8] sm:$0xff] %v914_v49  ;;  %v878_v62 = vadd.f32 %v862_v47, %v803_v16  ;;  %v879_v63 = vadd.f32 %v863_v52, %v804_v17  ;;  %v837_v18 = vld [vmem:[#allocation7] sm:$0x3]  ;;  %vm908_vm5 = vmand %vm906_vm2, %vm907_vm3 }
 0x1f3   : > { %v826_v55 = vadd.f32 %v825_v41, %v805_v20  ;;  %923 = vst [vmem:[#allocation3 + $0x10] sm:$0xff] %v915_v50  ;;  %v881_v0 = vadd.f32 %v865_v53, %v806_v25  ;;  %930 = vst [vmem:[%s4526_s8] sm:$0x1] %v929_v60  ;;  %v917_v2 = vpack.c.bf16 %v877_v57, %v875_v51  ;;  %v840_v11 = vshrl.u32 %v839_v27, 7  ;;  %v910_v36 = vld [vmem:[#allocation2] sm:$0x3] }
 0x1f4   : > { %v814_v61 = vadd.f32 %v813_v48, %v806_v25  ;;  %924 = vst [vmem:[#allocation3 + $0x18] sm:$0xff] %v916_v56  ;;  %v880_v3 = vadd.f32 %v864_v54, %v805_v20  ;;  %v882_v4 = vadd.f32 %v866_v59, %v807_v33  ;;  %v918_v6 = vpack.c.bf16 %v878_v62, %v876_v58  ;;  %vm909_vm6 = vmor %vm908_vm5, %vm905_vm4 }
 0x1f5   : > { %v827_v1 = vadd.f32 %v826_v55, %v807_v33  ;;  %v919_v7 = vpack.c.bf16 %v881_v0, %v879_v63  ;;  %925 = vst [vmem:[#allocation3 + $0x20] sm:$0xff] %v917_v2  ;;  %v841_v16 = vsub.s32 0, %v840_v11  ;;  %v845_v19 = vsub.s32 1, %v840_v11 }
 0x1f6   : > { %v815_v5 = vrot.slane %v814_v61, 4  ;;  %v920_v9 = vpack.c.bf16 %v882_v4, %v880_v3  ;;  %926 = vst [vmem:[#allocation3 + $0x28] sm:$0xff] %v918_v6  ;;  %v3845_v20 = vmov 1966171168  }
 0x1f7   : > { %v828_v8 = vrot.slane %v827_v1, 4  ;;  %927 = vst [vmem:[#allocation3 + $0x30] sm:$0xff] %v919_v7  ;;  %v889_v21 = vunpack.c.l.s4 %v3845_v20  ;;  %v842_v25 = vrot.slane %v837_v18, %v841_v16  ;;  %v846_v28 = vrot.slane %v837_v18, %v845_v19 }
 0x1f8   : > { %v816_v10 = vadd.f32 %v815_v5, %v814_v61  ;;  %928 = vst [vmem:[#allocation3 + $0x38] sm:$0xff] %v920_v9 }
 0x1f9   : > { %v829_v12 = vadd.f32 %v828_v8, %v827_v1  ;;  %v890_v27 = vunpack.c.0.s8 %v889_v21 }
 0x1fa   : > { %v817_v13 = vrot.slane %v816_v10, 2 }
 0x1fb   : > { %v830_v14 = vrot.slane %v829_v12, 2  ;;  %v893_v33 = vsub.s32 %v890_v27, %v840_v11 }
 0x1fc   : > { %v818_v15 = vadd.f32 %v817_v13, %v816_v10 }
 0x1fd   : > { %v831_v17 = vadd.f32 %v830_v14, %v829_v12 }
 0x1fe   : > { %v819_v22 = vrot.slane %v818_v15, 1 }
 0x1ff   : > { %v832_v23 = vrot.slane %v831_v17, 1 }
 0x200   : > { %v820_v24 = vadd.f32 %v819_v22, %v818_v15 }
 0x201   : > { %v833_v26 = vadd.f32 %v832_v23, %v831_v17 }
 0x202   : > { %v835_v29 = vmul.f32 0.015625, %v820_v24 }
 0x203   : > { %v836_v30 = vmul.f32 0.015625, %v833_v26 }
 0x204   : > { %v849_v31 = vadd.f32 %v842_v25, %v835_v29 }
 0x205   : > { %v850_v32 = vadd.f32 %v846_v28, %v836_v30 }
 0x207   : > { %v2564_v34 = vpack.c.bf16 %v850_v32, %v849_v31 }
 0x209   : > { %v894_v35 = vrot.slane %v2564_v34, %v893_v33 }
 0x20b   : > { %v901_v37 = vrot.slane %v894_v35, %v893_v33 }
 0x20d   : > { %v911_v38 = vsel %vm909_vm6, %v901_v37, %v910_v36 }
 0x20e   : > { %912 = vst [vmem:[#allocation2] sm:$0x3] %v911_v38 }
 0x20f PF: > { %v3218_v39 = vld [vmem:[%s4493_s12 + $0x40] sm:$0xff]   ;;  %v3222_v43 = vld [vmem:[%s4493_s12 + $0x48] sm:$0xff]   ;;  %v3226_v47 = vld [vmem:[%s4493_s12 + $0x50] sm:$0xff]   ;;  %v985_v4 = vlaneseq  ;;  %v3846_v8 = vmov 1966171168   ;;  %vm3848_vm7 = vmmov 0  }
 0x210   : > { %v3219_v40 = vld [vmem:[%s4493_s12] sm:$0xff]   ;;  %2638 = vmatprep.subr.bf16.mxu0 %v3218_v39  ;;  %v3223_v44 = vld [vmem:[%s4493_s12 + $0x8] sm:$0xff]   ;;  %v3227_v48 = vld [vmem:[%s4493_s12 + $0x10] sm:$0xff]   ;;  %v983_v9 = vunpack.c.l.s4 %v3846_v8  ;;  %v3847_v39 = vmov 0.0|0.0   ;;  %vm1902_vm8 = vcmask 1043456   ;;  %vm1819_vm9 = vcmask 31744  }
 0x211   : > { %v4549_v41 = vld [vmem:[%s4500_s20 + $0x40] sm:$0xff]   ;;  %2639 = vmatpush3.bf16.msra.mxu0 %v3219_v40  ;;  %v4559_v45 = vld [vmem:[%s4500_s20 + $0x48] sm:$0xff]   ;;  %v4569_v49 = vld [vmem:[%s4500_s20 + $0x50] sm:$0xff]   ;;  %v4619_v10 = vshrl.u32 %v985_v4, 7  ;;  %s5047_s19 = sld [smem:[#allocation38_spill]]  ;;  %s2261_s26 = sshll.u32 %s4526_s8, 4  ;;  %s4843_s26 = int_to_ptr.vmem [resolvable:$true] %s2261_s26 }
 0x212   : > { %v4552_v42 = vld [vmem:[%s4500_s20] sm:$0xff]   ;;  %2660 = vmatprep.subr.bf16.mxu1 %v4549_v41  ;;  %2640 = vmatprep.subr.bf16.mxu0 %v3222_v43  ;;  %v4562_v46 = vld [vmem:[%s4500_s20 + $0x8] sm:$0xff]   ;;  %v4572_v50 = vld [vmem:[%s4500_s20 + $0x10] sm:$0xff]   ;;  %v984_v13 = vunpack.c.0.s8 %v983_v9  ;;  %s5048_s4 = sld [smem:[#allocation59_spill]]  ;;  %s3674_s2 = scalar_lea.vmem %s4843_s26, 16 }
 0x213   : > { %2661 = vmatpush3.bf16.msra.mxu1 %v4552_v42  ;;  %v3230_v51 = vld [vmem:[%s4493_s12 + $0x58] sm:$0xff]   ;;  %v3234_v55 = vld [vmem:[%s4493_s12 + $0x60] sm:$0xff]   ;;  %v3238_v59 = vld [vmem:[%s4493_s12 + $0x68] sm:$0xff]   ;;  %p3675_p12 = scmp.ne.s32.totalorder %s4843_s26, %s3674_s2  ;;  %p5049_p3 = scmp.ne.s32.totalorder %s5009_s25, 0 }
 0x214   : > { %2662 = vmatprep.subr.bf16.mxu1 %v4559_v45  ;;  %v3231_v52 = vld [vmem:[%s4493_s12 + $0x18] sm:$0xff]   ;;  %v3235_v56 = vld [vmem:[%s4493_s12 + $0x20] sm:$0xff]   ;;  %v3239_v60 = vld [vmem:[%s4493_s12 + $0x28] sm:$0xff]   ;;  %v987_v14 = vsub.s32 %v984_v13, %v4619_v10 }
 0x215   : > { %2641 = vmatpush3.bf16.msra.mxu0 %v3223_v44  ;;  %v4579_v53 = vld [vmem:[%s4500_s20 + $0x58] sm:$0xff]   ;;  %v4589_v57 = vld [vmem:[%s4500_s20 + $0x60] sm:$0xff]   ;;  %v4599_v61 = vld [vmem:[%s4500_s20 + $0x68] sm:$0xff]   ;;  %p3676_p8 = pnand %p3675_p12, %p5049_p3 }
 0x216   : > { %2642 = vmatprep.subr.bf16.mxu0 %v3226_v47  ;;  %v4582_v54 = vld [vmem:[%s4500_s20 + $0x18] sm:$0xff]   ;;  %v4592_v58 = vld [vmem:[%s4500_s20 + $0x20] sm:$0xff]   ;;  %v4602_v62 = vld [vmem:[%s4500_s20 + $0x28] sm:$0xff]  }
 0x217   : > { %2663 = vmatpush3.bf16.msra.mxu1 %v4562_v46  ;;  %v3242_v63 = vld [vmem:[%s4493_s12 + $0x70] sm:$0xff]   ;;  %v3246_v3 = vld [vmem:[%s4493_s12 + $0x78] sm:$0xff]   ;;  %v3250_v15 = vld [vmem:[%s4507_s17 + $0x40] sm:$0xff]   ;;  %s2633_s10 = sshll.u32 %s5047_s19, 4  ;;  %p3677_p10 = pneg %p3676_p8 }
 0x218   : > { %2664 = vmatprep.subr.bf16.mxu1 %v4569_v49  ;;  %v3243_v0 = vld [vmem:[%s4493_s12 + $0x30] sm:$0xff]   ;;  %v3247_v5 = vld [vmem:[%s4493_s12 + $0x38] sm:$0xff]   ;;  %v4627_v18 = vld [vmem:[#allocation3 + $0x8] sm:$0xff]  ;;  %s4841_s12 = scalar_lea.hbm %s5048_s4, %s2633_s10 }
 0x219   : > { %2643 = vmatpush3.bf16.msra.mxu0 %v3227_v48  ;;  %v4609_v1 = vld [vmem:[%s4500_s20 + $0x70] sm:$0xff]   ;;  %v3248_v6 = vld [vmem:[%s4500_s20 + $0x78] sm:$0xff]   ;;  %v4630_v19 = vld [vmem:[%s4507_s17] sm:$0xff]  }
 0x21a   : > { %2644 = vmatprep.subr.bf16.mxu0 %v3230_v51  ;;  %v4612_v2 = vld [vmem:[%s4500_s20 + $0x30] sm:$0xff]   ;;  %v3249_v11 = vld [vmem:[%s4500_s20 + $0x38] sm:$0xff]   ;;  %v4663_v26 = vld [vmem:[%s4507_s17 + $0x60] sm:$0xff]   ;;  %s3850_s20 = smov [#allocation25]  }
 0x21b   : > { %2665 = vmatpush3.bf16.msra.mxu1 %v4572_v50  ;;  %v2565_v7 = vld.sshfl [vmem:[#allocation2] sm:$0x11 pattern:$0x75316420]  ;;  %v4633_v20 = vld [vmem:[%s4507_s17 + $0x48] sm:$0xff]   ;;  %v4653_v24 = vld [vmem:[%s4507_s17 + $0x58] sm:$0xff]  }
 0x21c   : > { %2666 = vmatprep.subr.bf16.mxu1 %v4579_v53  ;;  %v981_v12 = vcombine.high %v2565_v7, %v2565_v7  ;;  %v4625_v17 = vrot.slane %v2565_v7, %v987_v14  ;;  %v3253_v21 = vld [vmem:[%s4507_s17 + $0x8] sm:$0xff]   ;;  %v4644_v22 = vld [vmem:[%s4507_s17 + $0x50] sm:$0xff]   ;;  %v4659_v25 = vld [vmem:[%s4507_s17 + $0x18] sm:$0xff]  }
 0x21d   : > { %2645 = vmatpush3.bf16.msra.mxu0 %v3231_v52  ;;  %v4649_v23 = vld [vmem:[%s4507_s17 + $0x10] sm:$0xff]   ;;  %v4669_v28 = vld [vmem:[%s4507_s17 + $0x20] sm:$0xff]   ;;  %v4672_v27 = vld [vmem:[%s4507_s17 + $0x68] sm:$0xff]  }
 0x21e   : > { %2646 = vmatprep.subr.bf16.mxu0 %v3234_v55  ;;  %v995_v16 = vrot.slane %v981_v12, %v987_v14  ;;  %v4676_v29 = vld [vmem:[%s4507_s17 + $0x28] sm:$0xff]   ;;  %v4680_v30 = vld [vmem:[%s4507_s17 + $0x70] sm:$0xff]   ;;  %v4693_v32 = vld [vmem:[%s4507_s17 + $0x78] sm:$0xff]  }
 0x21f   : > { %2667 = vmatpush3.bf16.msra.mxu1 %v4582_v54  ;;  %v4689_v31 = vld [vmem:[%s4507_s17 + $0x30] sm:$0xff]   ;;  %v4698_v33 = vld [vmem:[%s4507_s17 + $0x38] sm:$0xff]   ;;  %v1616_v35 = vld [vmem:[#allocation10 + $0x8] sm:$0xff] }
 0x220   : > { %2668 = vmatprep.subr.bf16.mxu1 %v4589_v57  ;;  %1126 = vmatprep.mubr.bf16.mxu0 %v995_v16  ;;  %v1615_v34 = vld [vmem:[#allocation10] sm:$0xff]  ;;  %v4703_v37 = vld [vmem:[#allocation3 + $0x18] sm:$0xff]  ;;  %v1620_v44 = vld [vmem:[#allocation10 + $0x28] sm:$0xff] }
 0x221   : > { %2647 = vmatpush3.bf16.msra.mxu0 %v3235_v56  ;;  %1296 = vmatprep.mubr.bf16.mxu1 %v995_v16  ;;  %v4701_v36 = vld [vmem:[#allocation3] sm:$0xff]  ;;  %v2964_v38 = vpack.c.bf16 %v1616_v35, %v1615_v34  ;;  %v1617_v40 = vld [vmem:[#allocation10 + $0x10] sm:$0xff]  ;;  %v1624_v52 = vld [vmem:[#allocation10 + $0x48] sm:$0xff] }
 0x222   : > { %2648 = vmatprep.subr.bf16.mxu0 %v3238_v59  ;;  %v1619_v43 = vld [vmem:[#allocation10 + $0x20] sm:$0xff]  ;;  %v1621_v48 = vld [vmem:[#allocation10 + $0x30] sm:$0xff]  ;;  %v1167_v7 = vld [vmem:[%s682_s23] sm:$0x1]  ;;  %s3678_s23 = sshll.u32 %s3850_s20, 4  ;;  %s3679_s23 = int_to_ptr.vmem [resolvable:$false] %s3678_s23 }
 0x223   : > { %2669 = vmatpush3.bf16.msra.mxu1 %v4592_v58  ;;  %v2970_v47 = vpack.c.bf16 %v1620_v44, %v1619_v43  ;;  %v1623_v51 = vld [vmem:[#allocation10 + $0x40] sm:$0xff]  ;;  %v1625_v56 = vld [vmem:[#allocation10 + $0x50] sm:$0xff]  ;;  %s3680_s0 = scalar_lea.vmem %s3679_s23, 32  ;;  %p3681_p11 = scmp.lt.s32.totalorder %s4843_s26, %s3679_s23 }
 0x224   : > { %2670 = vmatprep.subr.bf16.mxu1 %v4599_v61  ;;  %v2976_v55 = vpack.c.bf16 %v1624_v52, %v1623_v51  ;;  %v938_v59 = vld [vmem:[#allocation3 + $0x30] sm:$0xff]  ;;  %p3682_p0 = scmp.lt.s32.totalorder %s3680_s0, %s3674_s2 }
 0x225   : > { %2649 = vmatpush3.bf16.msra.mxu0 %v3239_v60  ;;  %v1627_v60 = vld [vmem:[#allocation10 + $0x60] sm:$0xff] }
 0x226   : > { %2650 = vmatprep.subr.bf16.mxu0 %v3242_v63  ;;  %v1629_v63 = vld [vmem:[#allocation10 + $0x70] sm:$0xff]  ;;  %p3683_p2 = por %p3682_p0, %p3681_p11 }
 0x227   : > { %2671 = vmatpush3.bf16.msra.mxu1 %v4602_v62 }
 0x228   : > { %2672 = vmatprep.subr.bf16.mxu1 %v4609_v1  ;;  %p3684_p6 = pnand %p3683_p2, %p3677_p10 }
 0x229   : > { %2651 = vmatpush3.bf16.msra.mxu0 %v3243_v0  ;;  %v1630_v0 = vld [vmem:[#allocation10 + $0x78] sm:$0xff] }
 0x22a   : > { %2652 = vmatprep.subr.bf16.mxu0 %v3246_v3 }
 0x22b   : > { %2673 = vmatpush3.bf16.msra.mxu1 %v4612_v2 }
 0x22c   : > { %2674 = vmatprep.subr.bf16.mxu1 %v3248_v6 }
 0x22d   : > { %2653 = vmatpush3.bf16.msra.mxu0 %v3247_v5  ;;  %v972_v5 = vld [vmem:[%s665_s6] sm:$0x1]  ;;  %s2249_s6 = scalar_lea.sflag [#allocation6], %s4470_s7 }
 0x22e   : > { %2682 = vmatprep.subr.bf16.mxu0 %v4549_v41  ;;  %v1618_v41 = vld [vmem:[#allocation10 + $0x18] sm:$0xff] }
 0x22f   : > { %2675 = vmatpush3.bf16.msra.mxu1 %v3249_v11 }
 0x230   : > { %2722 = vmatprep.subr.bf16.mxu1 %v3250_v15  ;;  %1127 = vmatmul.mubr.bf16.vlgmr.msra.gmra.mrb[0].mxu0 %v4625_v17 }
 0x231   : > { %2683 = vmatpush3.bf16.msra.mxu0 %v4552_v42  ;;  %1342 = vmatprep.mubr.bf16.mxu0 %v4627_v18  ;;  %v2967_v42 = vpack.c.bf16 %v1618_v41, %v1617_v40 }
 0x232   : > { %1297 = vmatmul.mubr.bf16.vlgmr.msra.gmra.mrb[0].mxu1 %v4625_v17  ;;  %2684 = vmatprep.subr.bf16.mxu0 %v4559_v45  ;;  %v934_v45 = vld [vmem:[#allocation3 + $0x10] sm:$0xff] }
 0x233   : > { %2723 = vmatpush3.bf16.msra.mxu1 %v4630_v19  ;;  %1536 = vmatprep.mubr.bf16.mxu1 %v995_v16 }
 0x234   : > { %2724 = vmatprep.subr.bf16.mxu1 %v4633_v20 }
 0x235   : > { %2685 = vmatpush3.bf16.msra.mxu0 %v4562_v46  ;;  %v937_v46 = vld [vmem:[#allocation3 + $0x28] sm:$0xff] }
 0x236   : > { %2686 = vmatprep.subr.bf16.mxu0 %v4569_v49  ;;  %v1622_v49 = vld [vmem:[#allocation10 + $0x38] sm:$0xff] }
 0x237   : > { %2725 = vmatpush3.bf16.msra.mxu1 %v3253_v21 }
 0x238   : > { %2726 = vmatprep.subr.bf16.mxu1 %v4644_v22 }
 0x239   : > { %2687 = vmatpush3.bf16.msra.mxu0 %v4572_v50  ;;  %v2973_v50 = vpack.c.bf16 %v1622_v49, %v1621_v48 }
 0x23a   : > { %2688 = vmatprep.subr.bf16.mxu0 %v4579_v53  ;;  %v936_v53 = vld [vmem:[#allocation3 + $0x20] sm:$0xff] }
 0x23b   : > { %2727 = vmatpush3.bf16.msra.mxu1 %v4649_v23 }
 0x23c   : > { %2728 = vmatprep.subr.bf16.mxu1 %v4653_v24 }
 0x23d   : > { %2689 = vmatpush3.bf16.msra.mxu0 %v4582_v54  ;;  %v939_v54 = vld [vmem:[#allocation3 + $0x38] sm:$0xff] }
 0x23e   : > { %2690 = vmatprep.subr.bf16.mxu0 %v4589_v57  ;;  %v1626_v57 = vld [vmem:[#allocation10 + $0x58] sm:$0xff] }
 0x23f   : > { %2729 = vmatpush3.bf16.msra.mxu1 %v4659_v25 }
 0x240   : > { %2730 = vmatprep.subr.bf16.mxu1 %v4663_v26 }
 0x241   : > { %2691 = vmatpush3.bf16.msra.mxu0 %v4592_v58  ;;  %v2979_v58 = vpack.c.bf16 %v1626_v57, %v1625_v56 }
 0x242   : > { %2692 = vmatprep.subr.bf16.mxu0 %v4599_v61  ;;  %v1628_v61 = vld [vmem:[#allocation10 + $0x68] sm:$0xff] }
 0x243   : > { %2731 = vmatpush3.bf16.msra.mxu1 %v4669_v28 }
 0x244   : > { %2732 = vmatprep.subr.bf16.mxu1 %v4672_v27 }
 0x245   : > { %2693 = vmatpush3.bf16.msra.mxu0 %v4602_v62  ;;  %v2982_v62 = vpack.c.bf16 %v1628_v61, %v1627_v60 }
 0x246   : > { %2694 = vmatprep.subr.bf16.mxu0 %v4609_v1  ;;  %v2985_v1 = vpack.c.bf16 %v1630_v0, %v1629_v63 }
 0x247   : > { %2733 = vmatpush3.bf16.msra.mxu1 %v4676_v29 }
 0x248   : > { %2734 = vmatprep.subr.bf16.mxu1 %v4680_v30 }
 0x249   : > { %2695 = vmatpush3.bf16.msra.mxu0 %v4612_v2  ;;  %v3849_v2 = vmov 0.0  }
 0x24a   : > { %2696 = vmatprep.subr.bf16.mxu0 %v3248_v6 }
 0x24b   : > { %2735 = vmatpush3.bf16.msra.mxu1 %v4689_v31 }
 0x24c   : > { %2736 = vmatprep.subr.bf16.mxu1 %v4693_v32 }
 0x24d   : > { %2697 = vmatpush3.bf16.msra.mxu0 %v3249_v11 }
 0x24e   : > { %2744 = vmatprep.subr.bf16.mxu0 %v3250_v15 }
 0x24f   : > { %2737 = vmatpush3.bf16.msra.mxu1 %v4698_v33 }
 0x250   : > { %2963 = vmatprep.subr.bf16.mxu1 %v3847_v39  ;;  %1343 = vmatmul.mubr.bf16.vlgmr.msra.gmra.mrb[4].mxu0 %v4701_v36 }
 0x251   : > { %1350 = vmatprep.mubr.bf16.mxu0 %v4703_v37  ;;  %2745 = vmatpush3.bf16.msra.mxu0 %v4630_v19 }
 0x252   : > { %1537 = vmatmul.mubr.bf16.vlgmr.msra.gmra.mrb[4].mxu1 %v4625_v17  ;;  %2746 = vmatprep.subr.bf16.mxu0 %v4633_v20  ;;  %v4744_v20 = vsub.s32 0, %v4619_v10 }
 0x253   : > { %2965 = vmatpush3.bf16.msra.mxu1 %v2964_v38  ;;  %2877 = vmatprep.mubr.msk.f32.mxu1 %vm3848_vm7, %v3849_v2 }
 0x254   : > { %2966 = vmatprep.subr.bf16.mxu1 %v3847_v39 }
 0x255   : > { %2747 = vmatpush3.bf16.msra.mxu0 %v3253_v21  ;;  %v1308_v21 = vrot.slane %v1167_v7, %v4744_v20 }
 0x256   : > { %2748 = vmatprep.subr.bf16.mxu0 %v4644_v22 }
 0x257   : > { %2968 = vmatpush3.bf16.msra.mxu1 %v2967_v42 }
 0x258   : > { %2969 = vmatprep.subr.bf16.mxu1 %v3847_v39  ;;  %1351 = vmatmul.mubr.bf16.gmra.mrb[8].mxu0 %v934_v45 }
 0x259   : > { %1358 = vmatprep.mubr.bf16.mxu0 %v937_v46  ;;  %2749 = vmatpush3.bf16.msra.mxu0 %v4649_v23 }
 0x25a   : > { %2750 = vmatprep.subr.bf16.mxu0 %v4653_v24 }
 0x25b   : > { %2971 = vmatpush3.bf16.msra.mxu1 %v2970_v47 }
 0x25c   : > { %2972 = vmatprep.subr.bf16.mxu1 %v3847_v39 }
 0x25d   : > { %2751 = vmatpush3.bf16.msra.mxu0 %v4659_v25 }
 0x25e   : > { %2752 = vmatprep.subr.bf16.mxu0 %v4663_v26 }
 0x25f   : > { %2974 = vmatpush3.bf16.msra.mxu1 %v2973_v50 }
 0x260   : > { %2975 = vmatprep.subr.bf16.mxu1 %v3847_v39  ;;  %1359 = vmatmul.mubr.bf16.gmra.mrb[12].mxu0 %v936_v53 }
 0x261   : > { %1366 = vmatprep.mubr.bf16.mxu0 %v939_v54  ;;  %2753 = vmatpush3.bf16.msra.mxu0 %v4669_v28 }
 0x262   : > { %2754 = vmatprep.subr.bf16.mxu0 %v4672_v27 }
 0x263   : > { %2977 = vmatpush3.bf16.msra.mxu1 %v2976_v55 }
 0x264   : > { %2978 = vmatprep.subr.bf16.mxu1 %v3847_v39 }
 0x265   : > { %2755 = vmatpush3.bf16.msra.mxu0 %v4676_v29 }
 0x266   : > { %2756 = vmatprep.subr.bf16.mxu0 %v4680_v30 }
 0x267   : > { %2980 = vmatpush3.bf16.msra.mxu1 %v2979_v58 }
 0x268   : > { %2981 = vmatprep.subr.bf16.mxu1 %v3847_v39  ;;  %1367 = vmatmul.mubr.bf16.gmra.mrb[16].mxu0 %v938_v59 }
 0x269   : > { %1582 = vmatprep.mubr.bf16.mxu0 %v4627_v18  ;;  %2757 = vmatpush3.bf16.msra.mxu0 %v4689_v31 }
 0x26a   : > { %2758 = vmatprep.subr.bf16.mxu0 %v4693_v32 }
 0x26b   : > { %2983 = vmatpush3.bf16.msra.mxu1 %v2982_v62 }
 0x26c   : > { %2984 = vmatprep.subr.bf16.mxu1 %v3847_v39 }
 0x26d   : > { %2759 = vmatpush3.bf16.msra.mxu0 %v4698_v33 }
 0x26e   : > { %2988 = vmatprep.subr.bf16.mxu0 %v2964_v38 }
 0x26f   : > { %2986 = vmatpush3.bf16.msra.mxu1 %v2985_v1 }
 0x270   : > { %1583 = vmatmul.mubr.bf16.vlgmr.msra.gmra.mrb[20].mxu0 %v4701_v36  ;;  %2924 = vmatprep.subr.mxu1 %v3849_v2 }
 0x271   : > { %2990 = vmatpush3.bf16.msra.mxu0 %v2964_v38  ;;  %1590 = vmatprep.mubr.bf16.mxu0 %v4703_v37 }
 0x272   : > { %2992 = vmatprep.subr.bf16.mxu0 %v2967_v42 }
 0x275   : > { %2994 = vmatpush3.bf16.msra.mxu0 %v2967_v42 }
 0x276   : > { %2996 = vmatprep.subr.bf16.mxu0 %v2970_v47 }
 0x278   : > { %1591 = vmatmul.mubr.bf16.gmra.mrb[24].mxu0 %v934_v45 }
 0x279   : > { %2998 = vmatpush3.bf16.msra.mxu0 %v2970_v47  ;;  %1598 = vmatprep.mubr.bf16.mxu0 %v937_v46 }
 0x27a   : > { %3000 = vmatprep.subr.bf16.mxu0 %v2973_v50 }
 0x27d   : > { %3002 = vmatpush3.bf16.msra.mxu0 %v2973_v50 }
 0x27e   : > { %3004 = vmatprep.subr.bf16.mxu0 %v2976_v55 }
 0x280   : > { %1599 = vmatmul.mubr.bf16.gmra.mrb[28].mxu0 %v936_v53 }
 0x281   : > { %3006 = vmatpush3.bf16.msra.mxu0 %v2976_v55  ;;  %1606 = vmatprep.mubr.bf16.mxu0 %v939_v54 }
 0x282   : > { %3008 = vmatprep.subr.bf16.mxu0 %v2979_v58 }
 0x285   : > { %3010 = vmatpush3.bf16.msra.mxu0 %v2979_v58 }
 0x286   : > { %3012 = vmatprep.subr.bf16.mxu0 %v2982_v62 }
 0x288   : > { %1607 = vmatmul.mubr.bf16.gmra.mrb[32].mxu0 %v938_v59 }
 0x289   : > { %3014 = vmatpush3.bf16.msra.mxu0 %v2982_v62 }
 0x28a   : > { %3016 = vmatprep.subr.bf16.mxu0 %v2985_v1 }
 0x28d   : > { %3018 = vmatpush3.bf16.msra.mxu0 %v2985_v1 }
 0x303   : > { %v2654_v3 = vpop.f32.mrb[0].mxu0 }
 0x304   : > { %v2655_v6 = vpop.f32.mrb[1].mxu0 }
 0x305   : > { %v2676_v4 = vpop.f32.mrb[0].mxu1  ;;  %v2656_v9 = vadd.f32 %v2655_v6, %v2654_v3  ;;  %v2657_v11 = vpop.f32.mrb[2].mxu0 }
 0x306   : > { %v2677_v8 = vpop.f32.mrb[1].mxu1  ;;  %v2658_v14 = vpop.f32.mrb[3].mxu0 }
 0x307   : > { %v2678_v12 = vadd.f32 %v2677_v8, %v2676_v4  ;;  %v2679_v13 = vpop.f32.mrb[2].mxu1  ;;  %v1129_v16 = vadd.f32 %v2656_v9, %v972_v5 }
 0x308   : > { %v2680_v15 = vpop.f32.mrb[3].mxu1 }
 0x309   : > { %v1299_v17 = vadd.f32 %v2678_v12, %v1167_v7  ;;  %v1134_v18 = vmul.f32 0.17677669, %v1129_v16 }
 0x30b   : > { %v1631_v19 = vmul.f32 %v1299_v17, %v1134_v18  ;;  %v1705_v31 = vrot.slane %v1134_v18, %v4744_v20 }
 0x30d   : > { %2878 = vmatmul.mubr.f32.vlgmr.msra.gmra.mrb[8].mxu1 %v1631_v19 }
 0x30e   : > { %2926 = vmatprep.mubr.msk.f32.mxu1 %vm3848_vm7, %v3849_v2 }
 0x323   : > { %v2698_v22 = vpop.f32.mrb[4].mxu0 }
 0x324   : > { %v2699_v23 = vpop.f32.mrb[5].mxu0 }
 0x325   : > { %v2738_v24 = vpop.f32.mrb[4].mxu1  ;;  %v2700_v25 = vadd.f32 %v2699_v23, %v2698_v22  ;;  %v2701_v26 = vpop.f32.mrb[6].mxu0 }
 0x326   : > { %v2739_v28 = vpop.f32.mrb[5].mxu1  ;;  %v2702_v27 = vpop.f32.mrb[7].mxu0 }
 0x327   : > { %v4747_v29 = vadd.f32 %v2739_v28, %v2738_v24  ;;  %v2741_v30 = vpop.f32.mrb[6].mxu1  ;;  %v1345_v32 = vadd.f32 %v2700_v25, %v1308_v21  ;;  %v2703_v33 = vadd.f32 %v2702_v27, %v2701_v26 }
 0x328   : > { %v2742_v34 = vpop.f32.mrb[7].mxu1 }
 0x329   : > { %v1348_v35 = vadd.f32 %v2703_v33, %v1308_v21  ;;  %v1706_v10 = vmul.f32 %v1705_v31, %v1345_v32 }
 0x32b   : > { %v1707_v36 = vmul.f32 %v1705_v31, %v1348_v35  ;;  %v2704_v37 = vpop.f32.mrb[8].mxu0  ;;  %2912 = vmatprep.mubr.f32.mxu0 %v1706_v10 }
 0x32c   : > { %v2705_v38 = vpop.f32.mrb[9].mxu0 }
 0x32d   : > { %v2706_v39 = vadd.f32 %v2705_v38, %v2704_v37  ;;  %v2707_v40 = vpop.f32.mrb[10].mxu0  ;;  %2913 = vmatmul.mubr.f32.vlgmr.msra.gmra.mrb[36].mxu0 %v1707_v36 }
 0x32e   : > { %v2708_v41 = vpop.f32.mrb[11].mxu0 }
 0x32f   : > { %v1353_v42 = vadd.f32 %v2706_v39, %v1308_v21  ;;  %v2709_v43 = vadd.f32 %v2708_v41, %v2707_v40 }
 0x331   : > { %v1356_v44 = vadd.f32 %v2709_v43, %v1308_v21  ;;  %v1708_v45 = vmul.f32 %v1705_v31, %v1353_v42 }
 0x333   : > { %v2710_v46 = vpop.f32.mrb[12].mxu0  ;;  %2915 = vmatprep.mubr.f32.mxu0 %v1708_v45  ;;  %v1709_v47 = vmul.f32 %v1705_v31, %v1356_v44 }
 0x334   : > { %v2711_v48 = vpop.f32.mrb[13].mxu0 }
 0x335   : > { %v2712_v49 = vadd.f32 %v2711_v48, %v2710_v46  ;;  %v2713_v50 = vpop.f32.mrb[14].mxu0  ;;  %2916 = vmatmul.mubr.f32.gmra.mrb[38].mxu0 %v1709_v47 }
 0x336   : > { %v2714_v51 = vpop.f32.mrb[15].mxu0 }
 0x337   : > { %v1361_v52 = vadd.f32 %v2712_v49, %v1308_v21  ;;  %v2715_v53 = vadd.f32 %v2714_v51, %v2713_v50 }
 0x339   : > { %v1364_v54 = vadd.f32 %v2715_v53, %v1308_v21  ;;  %v1710_v55 = vmul.f32 %v1705_v31, %v1361_v52 }
 0x33b   : > { %v2716_v56 = vpop.f32.mrb[16].mxu0  ;;  %2918 = vmatprep.mubr.f32.mxu0 %v1710_v55  ;;  %v1711_v57 = vmul.f32 %v1705_v31, %v1364_v54 }
 0x33c   : > { %v2717_v58 = vpop.f32.mrb[17].mxu0 }
 0x33d   : > { %v2718_v59 = vadd.f32 %v2717_v58, %v2716_v56  ;;  %v2719_v60 = vpop.f32.mrb[18].mxu0  ;;  %2919 = vmatmul.mubr.f32.gmra.mrb[40].mxu0 %v1711_v57 }
 0x33e   : > { %v2720_v61 = vpop.f32.mrb[19].mxu0 }
 0x33f   : > { %v1369_v62 = vadd.f32 %v2718_v59, %v1308_v21  ;;  %v2721_v63 = vadd.f32 %v2720_v61, %v2719_v60 }
 0x341   : > { %v1372_v0 = vadd.f32 %v2721_v63, %v1308_v21  ;;  %v1712_v1 = vmul.f32 %v1705_v31, %v1369_v62 }
 0x343   : > { %2921 = vmatprep.mubr.f32.mxu0 %v1712_v1  ;;  %v1713_v3 = vmul.f32 %v1705_v31, %v1372_v0  ;;  %v2760_v4 = vpop.f32.mrb[20].mxu0  ;;  %v4766_v31 = vld [vmem:[#allocation12] sm:$0xf] }
 0x344   : > { %v2761_v5 = vpop.f32.mrb[21].mxu0  ;;  %2925 = vmatpush3.msk.msra.mxu1 %vm1902_vm8, %v4766_v31 }
 0x345   : > { %2922 = vmatmul.mubr.f32.gmra.mrb[42].mxu0 %v1713_v3  ;;  %v4750_v6 = vadd.f32 %v2761_v5, %v2760_v4  ;;  %v2763_v7 = vpop.f32.mrb[22].mxu0  ;;  %2929 = vmatprep.subr.msk.mxu1 %vm1902_vm8, %v4766_v31 }
 0x346   : > { %v2764_v8 = vpop.f32.mrb[23].mxu0 }
 0x347   : > { %v4752_v9 = vadd.f32 %v2764_v8, %v2763_v7 }
 0x34b   : > { %v2766_v11 = vpop.f32.mrb[24].mxu0 }
 0x34c   : > { %v2767_v12 = vpop.f32.mrb[25].mxu0 }
 0x34d   : > { %v4754_v13 = vadd.f32 %v2767_v12, %v2766_v11  ;;  %v2769_v14 = vpop.f32.mrb[26].mxu0 }
 0x34e   : > { %v2770_v15 = vpop.f32.mrb[27].mxu0 }
 0x34f   : > { %v4756_v16 = vadd.f32 %v2770_v15, %v2769_v14 }
 0x353   : > { %v2772_v17 = vpop.f32.mrb[28].mxu0 }
 0x354   : > { %v2773_v18 = vpop.f32.mrb[29].mxu0 }
 0x355   : > { %v4758_v19 = vadd.f32 %v2773_v18, %v2772_v17  ;;  %v2775_v21 = vpop.f32.mrb[30].mxu0 }
 0x356   : > { %v2776_v22 = vpop.f32.mrb[31].mxu0 }
 0x357   : > { %v4760_v23 = vadd.f32 %v2776_v22, %v2775_v21 }
 0x35b   : > { %v2778_v24 = vpop.f32.mrb[32].mxu0 }
 0x35c   : > { %v2779_v25 = vpop.f32.mrb[33].mxu0 }
 0x35d   : > { %v4762_v26 = vadd.f32 %v2779_v25, %v2778_v24  ;;  %v2781_v28 = vpop.f32.mrb[34].mxu0 }
 0x35e   : > { %v2782_v27 = vpop.f32.mrb[35].mxu0 }
 0x35f   : > { %v4764_v30 = vadd.f32 %v2782_v27, %v2781_v28 }
 0x3e0   : > { %v4772_v32 = vpop.f32.mrb[8].mxu1 }
 0x3e1   : > { %v2879_v33 = vpop.f32.mrb[9].mxu1 }
 0x400   : > { %v2914_v34 = vpop.f32.mrb[36].mxu0 }
 0x401   : > { %v1780_v35 = vpop.f32.mrb[37].mxu0  ;;  %v1821_v38 = vsel %vm1819_vm9, %v2914_v34, -inf }
 0x402   : > { %v1820_v41 = vsel %vm1819_vm9, %v1780_v35, -inf }
 0x408   : > { %v2917_v10 = vpop.f32.mrb[38].mxu0 }
 0x409   : > { %v1790_v36 = vpop.f32.mrb[39].mxu0  ;;  %v1823_v47 = vsel %vm1819_vm9, %v2917_v10, -inf }
 0x40a   : > { %v1822_v50 = vsel %vm1819_vm9, %v1790_v36, -inf }
 0x410   : > { %v2920_v37 = vpop.f32.mrb[40].mxu0 }
 0x411   : > { %v1826_v39 = vsel %vm1819_vm9, %v2920_v37, -inf  ;;  %v1800_v40 = vpop.f32.mrb[41].mxu0 }
 0x412   : > { %v1827_v42 = vmax.f32 %v1821_v38, %v1826_v39  ;;  %v1824_v43 = vsel %vm1819_vm9, %v1800_v40, -inf }
 0x413   : > { %v1825_v44 = vmax.f32 %v1820_v41, %v1824_v43 }
 0x415   : > { %v1832_v45 = vmax.f32 %v1825_v44, %v1827_v42 }
 0x418   : > { %v2923_v46 = vpop.f32.mrb[42].mxu0 }
 0x419   : > { %v1830_v48 = vsel %vm1819_vm9, %v2923_v46, -inf  ;;  %v1810_v49 = vpop.f32.mrb[43].mxu0 }
 0x41a   : > { %v1831_v51 = vmax.f32 %v1823_v47, %v1830_v48  ;;  %v1828_v52 = vsel %vm1819_vm9, %v1810_v49, -inf }
 0x41b   : > { %v1829_v53 = vmax.f32 %v1822_v50, %v1828_v52 }
 0x41d   : > { %v1833_v54 = vmax.f32 %v1829_v53, %v1831_v51 }
 0x41f   : > { %v1834_v55 = vmax.f32 %v1832_v45, %v1833_v54 }
 0x421   : > { %v1835_v56 = vrot.slane %v1834_v55, 4 }
 0x423   : > { %v1836_v57 = vmax.f32 %v1834_v55, %v1835_v56 }
 0x425   : > { %v1837_v58 = vrot.slane %v1836_v57, 2 }
 0x427   : > { %v1838_v59 = vmax.f32 %v1836_v57, %v1837_v58 }
 0x429   : > { %v1839_v60 = vrot.slane %v1838_v59, 1 }
 0x42b   : > { %v1840_v61 = vmax.f32 %v1838_v59, %v1839_v60 }
 0x42d   : > { %v1841_v62 = vmax.f32 %v4772_v32, %v1840_v61 }
 0x42f   : > { %v1842_v63 = vsub.f32 %v4772_v32, %v1841_v62  ;;  %v1848_v0 = vrot.slane %v1841_v62, %v4744_v20 }
 0x431   : > { %v1849_v1 = vsub.f32 %v1780_v35, %v1848_v0  ;;  %v1850_v3 = vsub.f32 %v2914_v34, %v1848_v0  ;;  %v1851_v4 = vsub.f32 %v1790_v36, %v1848_v0  ;;  %v1852_v5 = vsub.f32 %v2917_v10, %v1848_v0 }
 0x432   : > { %v1853_v7 = vsub.f32 %v1800_v40, %v1848_v0  ;;  %v1854_v8 = vsub.f32 %v2920_v37, %v1848_v0  ;;  %v1855_v11 = vsub.f32 %v1810_v49, %v1848_v0  ;;  %v1856_v12 = vsub.f32 %v2923_v46, %v1848_v0 }
 0x433   : > { %v1857_v14 = vmul.f32 1.442695, %v1849_v1  ;;  %v1859_v15 = vmul.f32 1.442695, %v1850_v3  ;;  %v1861_v17 = vmul.f32 1.442695, %v1851_v4 }
 0x434   : > { %v1863_v18 = vmul.f32 1.442695, %v1852_v5  ;;  %v1865_v21 = vmul.f32 1.442695, %v1853_v7  ;;  %v1867_v22 = vmul.f32 1.442695, %v1854_v8 }
 0x435   : > { %3274 = vpow2.f32 %v1857_v14  ;;  %v1869_v24 = vmul.f32 1.442695, %v1855_v11  ;;  %v1871_v25 = vmul.f32 1.442695, %v1856_v12  ;;  %v1843_v50 = vmul.f32 1.442695, %v1842_v63 }
 0x436   : > { %3276 = vpow2.f32 %v1859_v15  ;;  %v3267_v12 = vld [vmem:[%s4515_s14 + $0x8] sm:$0xff]   ;;  %v3268_v14 = vld [vmem:[%s4515_s14 + $0x10] sm:$0xff]   ;;  %v3269_v15 = vld [vmem:[%s4515_s14 + $0x18] sm:$0xff]  }
 0x437   : > { %3278 = vpow2.f32 %v1861_v17  ;;  %v3270_v17 = vld [vmem:[%s4515_s14 + $0x20] sm:$0xff]  }
 0x438   : > { %3280 = vpow2.f32 %v1863_v18  ;;  %v3271_v18 = vld [vmem:[%s4515_s14 + $0x28] sm:$0xff]  }
 0x439   : > { %3282 = vpow2.f32 %v1865_v21  ;;  %v3272_v21 = vld [vmem:[%s4515_s14 + $0x30] sm:$0xff]  }
 0x43a   : > { %3284 = vpow2.f32 %v1867_v22  ;;  %v3273_v22 = vld [vmem:[%s4515_s14 + $0x38] sm:$0xff]  }
 0x43b   : > { %3286 = vpow2.f32 %v1869_v24  ;;  %v1407_v24 = vld [vmem:[%s699_s11] sm:$0x1] }
 0x43c   : > { %3288 = vpow2.f32 %v1871_v25  ;;  %v1539_v25 = vadd.f32 %v4747_v29, %v1407_v24 }
 0x43d   : > { %3290 = vpow2.f32 %v1843_v50 }
 0x43f   : > { %v3275_v28 = vpop.eup %3274 }
 0x440   : > { %v3277_v27 = vpop.eup %3276  ;;  %v1873_v32 = vsel %vm1819_vm9, %v3275_v28, 0.0 }
 0x441   : > { %v3279_v33 = vpop.eup %3278  ;;  %v1874_v34 = vsel %vm1819_vm9, %v3277_v27, 0.0 }
 0x442   : > { %v3281_v35 = vpop.eup %3280  ;;  %v1875_v10 = vadd.f32 %v1874_v34, %v1873_v32  ;;  %v1876_v36 = vsel %vm1819_vm9, %v3279_v33, 0.0 }
 0x443   : > { %v3283_v37 = vpop.eup %3282  ;;  %v1878_v39 = vsel %vm1819_vm9, %v3281_v35, 0.0 }
 0x444   : > { %v1877_v38 = vadd.f32 %v1876_v36, %v1875_v10  ;;  %v3285_v40 = vpop.eup %3284  ;;  %v1880_v42 = vsel %vm1819_vm9, %v3283_v37, 0.0 }
 0x445   : > { %v3287_v43 = vpop.eup %3286  ;;  %v1882_v45 = vsel %vm1819_vm9, %v3285_v40, 0.0 }
 0x446   : > { %v1879_v41 = vadd.f32 %v1878_v39, %v1877_v38  ;;  %v3289_v46 = vpop.eup %3288  ;;  %v1884_v48 = vsel %vm1819_vm9, %v3287_v43, 0.0 }
 0x447   : > { %v1886_v51 = vsel %vm1819_vm9, %v3289_v46, 0.0  ;;  %v3291_v59 = vpop.eup %3290 }
 0x448   : > { %v1881_v44 = vadd.f32 %v1880_v42, %v1879_v41 }
 0x44a   : > { %v1883_v47 = vadd.f32 %v1882_v45, %v1881_v44 }
 0x44c   : > { %v1885_v49 = vadd.f32 %v1884_v48, %v1883_v47 }
 0x44e   : > { %v1887_v52 = vadd.f32 %v1886_v51, %v1885_v49 }
 0x450   : > { %v1888_v53 = vrot.slane %v1887_v52, 4 }
 0x452   : > { %v1889_v54 = vadd.f32 %v1888_v53, %v1887_v52 }
 0x454   : > { %v1890_v55 = vrot.slane %v1889_v54, 2 }
 0x456   : > { %v1891_v56 = vadd.f32 %v1890_v55, %v1889_v54 }
 0x458   : > { %v1892_v57 = vrot.slane %v1891_v56, 1 }
 0x45a   : > { %v1893_v58 = vadd.f32 %v1892_v57, %v1891_v56 }
 0x45c   : > { %v1894_v60 = vadd.f32 %v3291_v59, %v1893_v58 }
 0x45e   : > { %3292 = vrcp.f32 %v1894_v60 }
 0x468   : > { %v3293_v61 = vpop.eup %3292 }
 0x469   : > { %v1898_v62 = vmul.f32 %v3293_v61, %v3291_v59  ;;  %v1979_v0 = vrot.slane %v3293_v61, %v4744_v20 }
 0x46b   : > { %2927 = vmatmul.mubr.msk.f32.vlgmr.msra.gmra.mrb[10].mxu1 %vm1819_vm9, %v1898_v62  ;;  %v1980_v63 = vmul.f32 %v3275_v28, %v1979_v0  ;;  %v1981_v1 = vmul.f32 %v3277_v27, %v1979_v0  ;;  %v1982_v3 = vmul.f32 %v3279_v33, %v1979_v0  ;;  %v1983_v4 = vmul.f32 %v3281_v35, %v1979_v0 }
 0x46c   : > { %2930 = vmatpush3.msk.msra.mxu1 %vm1902_vm8, %v4766_v31  ;;  %v1984_v5 = vmul.f32 %v3283_v37, %v1979_v0  ;;  %v1985_v7 = vmul.f32 %v3285_v40, %v1979_v0  ;;  %v1986_v8 = vmul.f32 %v3287_v43, %v1979_v0  ;;  %v1987_v11 = vmul.f32 %v3289_v46, %v1979_v0  ;;  %v3266_v31 = vld [vmem:[%s4515_s14] sm:$0xff]  }
 0x46d   : > { %2931 = vmatprep.mubr.msk.f32.mxu1 %vm1819_vm9, %v1980_v63  ;;  %2943 = vmatprep.subr.bf16.mxu1 %v3849_v2  ;;  %v1548_v28 = vrot.slane %v1407_v24, %v4744_v20 }
 0x46f   : > { %2932 = vmatmul.mubr.msk.f32.vlgmr.msra.gmra.mrb[12].mxu1 %vm1819_vm9, %v1981_v1  ;;  %v1588_v34 = vadd.f32 %v4752_v9, %v1548_v28  ;;  %v1585_v10 = vadd.f32 %v4750_v6, %v1548_v28  ;;  %v1593_v41 = vadd.f32 %v4754_v13, %v1548_v28  ;;  %v1604_v43 = vadd.f32 %v4760_v23, %v1548_v28 }
 0x470   : > { %2934 = vmatprep.mubr.msk.f32.mxu1 %vm1819_vm9, %v1982_v3  ;;  %2944 = vmatpush3.bf16.msra.mxu1 %v3266_v31  ;;  %v1601_v9 = vadd.f32 %v4758_v19, %v1548_v28  ;;  %v1612_v49 = vadd.f32 %v4764_v30, %v1548_v28  ;;  %v1609_v51 = vadd.f32 %v4762_v26, %v1548_v28  ;;  %v2245_v26 = vld [vmem:[%s4526_s8] sm:$0x1] }
 0x471   : > { %2945 = vmatprep.subr.bf16.mxu1 %v3849_v2 }
 0x473   : > { %2935 = vmatmul.mubr.msk.f32.gmra.mrb[14].mxu1 %vm1819_vm9, %v1983_v4 }
 0x474   : > { %2937 = vmatprep.mubr.msk.f32.mxu1 %vm1819_vm9, %v1984_v5  ;;  %2946 = vmatpush3.bf16.msra.mxu1 %v3267_v12 }
 0x475   : > { %2947 = vmatprep.subr.bf16.mxu1 %v3849_v2 }
 0x477   : > { %2938 = vmatmul.mubr.msk.f32.gmra.mrb[16].mxu1 %vm1819_vm9, %v1985_v7 }
 0x478   : > { %2940 = vmatprep.mubr.msk.f32.mxu1 %vm1819_vm9, %v1986_v8  ;;  %2948 = vmatpush3.bf16.msra.mxu1 %v3268_v14 }
 0x479   : > { %2949 = vmatprep.subr.bf16.mxu1 %v3849_v2 }
 0x47b   : > { %2941 = vmatmul.mubr.msk.f32.gmra.mrb[18].mxu1 %vm1819_vm9, %v1987_v11 }
 0x47c   : > { %2959 = vmatprep.mubr.msk.bf16.mxu1 %vm3848_vm7, %v3849_v2  ;;  %2950 = vmatpush3.bf16.msra.mxu1 %v3269_v15 }
 0x47d   : > { %2951 = vmatprep.subr.bf16.mxu1 %v3849_v2 }
 0x480   : > { %2952 = vmatpush3.bf16.msra.mxu1 %v3270_v17 }
 0x481   : > { %2953 = vmatprep.subr.bf16.mxu1 %v3849_v2 }
 0x484   : > { %2954 = vmatpush3.bf16.msra.mxu1 %v3271_v18 }
 0x485   : > { %2955 = vmatprep.subr.bf16.mxu1 %v3849_v2 }
 0x488   : > { %2956 = vmatpush3.bf16.msra.mxu1 %v3272_v21 }
 0x489   : > { %2957 = vmatprep.subr.bf16.mxu1 %v3849_v2  ;;  %v1596_v2 = vadd.f32 %v4756_v16, %v1548_v28 }
 0x48c   : > { %2958 = vmatpush3.bf16.msra.mxu1 %v3273_v22 }
 0x53e   : > { %v1972_v27 = vpop.f32.mrb[10].mxu1 }
 0x53f   : > { %v2117_v32 = vmul.f32 %v1972_v27, %v1539_v25  ;;  %v2928_v33 = vpop.f32.mrb[11].mxu1 }
 0x542   : > { %v2933_v35 = vpop.f32.mrb[12].mxu1 }
 0x543   : > { %v2119_v36 = vmul.f32 %v2933_v35, %v1588_v34  ;;  %v2078_v37 = vpop.f32.mrb[13].mxu1 }
 0x544   : > { %v2118_v38 = vmul.f32 %v2078_v37, %v1585_v10 }
 0x546   : > { %v2126_v39 = vadd.f32 %v2119_v36, %v2118_v38  ;;  %v2936_v40 = vpop.f32.mrb[14].mxu1 }
 0x547   : > { %v2121_v29 = vmul.f32 %v2936_v40, %v1596_v2  ;;  %v2088_v42 = vpop.f32.mrb[15].mxu1 }
 0x548   : > { %v2120_v20 = vmul.f32 %v2088_v42, %v1593_v41 }
 0x54a   : > { %v2127_v44 = vadd.f32 %v2126_v39, %v2120_v20  ;;  %v2939_v45 = vpop.f32.mrb[16].mxu1 }
 0x54b   : > { %v2123_v46 = vmul.f32 %v2939_v45, %v1604_v43  ;;  %v2098_v6 = vpop.f32.mrb[17].mxu1 }
 0x54c   : > { %v2122_v47 = vmul.f32 %v2098_v6, %v1601_v9  ;;  %v2128_v48 = vadd.f32 %v2127_v44, %v2121_v29 }
 0x54e   : > { %v2129_v16 = vadd.f32 %v2128_v48, %v2122_v47  ;;  %v2942_v50 = vpop.f32.mrb[18].mxu1 }
 0x54f   : > { %v2125_v13 = vmul.f32 %v2942_v50, %v1612_v49  ;;  %v2108_v52 = vpop.f32.mrb[19].mxu1 }
 0x550   : > { %v2124_v23 = vmul.f32 %v2108_v52, %v1609_v51  ;;  %v2130_v53 = vadd.f32 %v2129_v16, %v2123_v46 }
 0x552   : > { %v2131_v54 = vadd.f32 %v2130_v53, %v2124_v23 }
 0x554   : > { %v2132_v55 = vadd.f32 %v2131_v54, %v2125_v13 }
 0x556   : > { %v2133_v19 = vrot.slane %v2132_v55, 4 }
 0x558   : > { %v2134_v56 = vadd.f32 %v2133_v19, %v2132_v55 }
 0x55a   : > { %v2135_v57 = vrot.slane %v2134_v56, 2 }
 0x55c   : > { %v2136_v58 = vadd.f32 %v2135_v57, %v2134_v56 }
 0x55e   : > { %v2137_v59 = vrot.slane %v2136_v58, 1 }
 0x560   : > { %v2138_v30 = vadd.f32 %v2137_v59, %v2136_v58 }
 0x562   : > { %v2139_v60 = vadd.f32 %v2138_v30, %v2117_v32 }
 0x564   : > { %v2140_v61 = vpack.c.bf16 %v2139_v60, %v2139_v60 }
 0x566   : > { %2960 = vmatmul.mubr.bf16.vlgmr.msra.gmra.mrb[20].mxu1 %v2140_v61 }
 0x639   : > { %v2239_v62 = vpop.f32.mrb[20].mxu1 }
 0x63a   : > { %v2246_v0 = vadd.f32 %v2245_v26, %v2239_v62  ;;  %v2961_v63 = vpop.f32.mrb[21].mxu1 }
 0x63b   : > { %v2242_v1 = vpop.f32.mrb[22].mxu1 }
 0x63c   : > { %2247 = vst [vmem:[%s4526_s8] sm:$0x1] %v2246_v0  ;;  %v2962_v3 = vpop.f32.mrb[23].mxu1 }
 0x63d   : > { %3687 = shalt.err (!%p3684_p6)
}
 0x63e   : > { %s3688_s7 = scalar_lea.hbm %s4841_s12, 16  ;;  %s3692_s11 = scalar_lea.hbm %s5048_s4, 32 }
 0x63f   : > { %p3689_p7 = scmp.ne.s32.totalorder %s4841_s12, %s3688_s7  ;;  %p3693_p13 = scmp.lt.u32.totalorder %s4841_s12, %s5048_s4 }
 0x640   : > { %p3694_p4 = scmp.lt.u32.totalorder %s3692_s11, %s3688_s7  ;;  %p3696_p12 = scmp.lt.u32.totalorder %s3688_s7, %s4841_s12 }
 0x641   : > { %p3690_p9 = pnand %p3689_p7, %p5049_p3 }
 0x642   : > { %p3695_p1 = por %p3694_p4, %p3693_p13 }
 0x643   : > { %p3691_p5 = pneg %p3690_p9 }
 0x644   : > { %p3697_p8 = por %p3696_p12, %p3695_p1 }
 0x646   : > { %p3698_p10 = pnand %p3697_p8, %p3691_p5 }
 0x648   : > { %3701 = shalt.err (!%p3698_p10)
}
 0x649   : > { %3055 = dma.vmem_to_hbm [thread:$0]  (%p5049_p3), %s4843_s26, 16, %s4841_s12, %s2249_s6  }
 0x64a PF: > { %p3113_p11 = scmp.ge.s32.totalorder %s3824_s18, 2  ;;  %s2273_s8 = sand.u32 1, %s3796_s28  }
 0x64b   : > { %p5050_p0 = scmp.ne.s32.totalorder %s5011_s5, 0  ;;  %s2274_s15 = scalar_lea.sflag [#allocation6], %s2273_s8 }
 0x64d   : > { %p3099_p2 = pnand %p3113_p11, %p5050_p0 }
 0x64f   : > { %3779 = dma.done.wait (!%p3099_p2), %s2274_s15, 16  }
 0x650   : > { %3781 = vsyncadd (!%p3099_p2), %s2274_s15, 4294967280  ;;  %s43_s18 = sadd.s32 1, %s3824_s18   ;;  %s5051_s25 = sld [smem:[#allocation35_spill]] }
 0x651   : > { %p40_p6 = scmp.ge.s32.totalorder %s43_s18, 6   ;;  %s5052_s26 = sld [smem:[#allocation36_spill]] }
 0x652   : > { %s5053_s19 = sld [smem:[#allocation45_spill]]  ;;  %s5054_s15 = sld [smem:[#allocation39_spill]] }
 0x653   : > { %s5055_s10 = sld [smem:[#allocation43_spill]]  ;;  %s5056_s17 = sld [smem:[#allocation44_spill]] }
 0x654   : > { %s5057_s27 = smov %s5070_s24  ;;  %s5058_s28 = smov %s3800_s29 }
 0x655   : > { %s5059_s29 = smov %s3804_s30  ;;  %s5061_s14 = smov %s3816_s16 }
 0x656   :  { %42 = sbr.rel (!%p40_p6) target bundleno = 34 (0x22), region = 226 }
 0x658   : > { %s5060_s30 = smov %s5053_s19 }
 0x659   : > { %s5062_s16 = smov %s5055_s10 }
 0x65d   :  { %2278 = vsyncpa [#allocation5], 1 }
 0x65e   :  { %2280 = vsyncpa [#allocation5 + $0x1], 1 }
 0x65f   :  { %2281 = vsyncpa [#allocation8], 1 }
 0x660   :  { %2282 = vsyncpa [#allocation11], 1 }
 0x661   :  { %2283 = vsyncpa [#allocation14], 1 }
 0x662   :  { %2285 = vsyncpa [#allocation14 + $0x1], 1 }
 0x663   :  { %2286 = vsyncpa [#allocation17], 1 }
 0x664   :  { %2288 = vsyncpa [#allocation17 + $0x1], 1 }
 0x665   :  { %2289 = vsyncpa [#allocation20], 1 }
 0x666   :  { %2291 = vsyncpa [#allocation20 + $0x1], 1 }
 0x667   :  { %2292 = vsyncpa [#allocation23], 1 }
 0x668   :  { %2294 = vsyncpa [#allocation23 + $0x1], 1 }
 0x669   :  { %2295 = vsyncpa [#allocation6], 1 }
 0x66a   :  { %2297 = vsyncpa [#allocation6 + $0x1], 1 }

</bundles_post_ra>
